<compile_context>
chip_gen: v7x
topology: tpu7x:2x2x1
jax: 0.10.0
libtpu: 0.0.40
codegen_flags: <defaults>
</compile_context>

<pallas_src>
import functools

import numpy as np
import jax
import jax.numpy as jnp
from jax.experimental import pallas as pl
from jax.experimental.pallas import tpu as pltpu


def _round_up(x, m):
    return (x + m - 1) // m * m


def _cdiv(a, b):
    return -(-a // b)


# ---------------------------------------------------------------------------
# Kernels
# ---------------------------------------------------------------------------

def _make_window_kernel(R, Cwin, Cpad):
    """Per grid step: fetch R per-row HBM windows, shift each, store per row."""

    def kernel(row_ref, base_ref, shift_ref, x_hbm, o_ref, buf, sems):
        first = pl.program_id(0) * R
        # All SMEM scalar reads before any DMA wait (wait breaks sst->sld
        # forwarding) and all R starts before the first wait (keeps the R
        # copies in flight together).
        rows = [row_ref[first + r] for r in range(R)]
        bases = [pl.multiple_of(base_ref[first + r], 128) for r in range(R)]
        shifts = [shift_ref[first + r] for r in range(R)]

        copies = []
        for r in range(R):
            cp = pltpu.make_async_copy(
                x_hbm.at[pl.ds(rows[r], 1), pl.ds(bases[r], Cwin)],  # (1, Cwin)
                buf.at[pl.ds(r, 1)],                                 # (1, Cwin)
                sems.at[r],
            )
            cp.start()
            copies.append(cp)

        for r in range(R):
            copies[r].wait()
            v = buf[pl.ds(r, 1), :]                       # (1, Cwin)
            rolled = pltpu.roll(v, shifts[r], axis=1)     # crop start -> lane 0
            # Per-row lane-dense store (Cpad % 128 == 0): keeps only ~Cwin/128
            # vregs live instead of concatenating R single-sublane pieces.
            o_ref[pl.ds(r, 1), :] = rolled[:, :Cpad]

    return kernel


def _make_fullrow_kernel(R, W, Cpad):
    """Whole (R, W) rows arrive via auto-pipelined BlockSpec; crop in-register."""
    Ctake = min(Cpad, W)

    def kernel(shift_ref, x_ref, o_ref):
        first = pl.program_id(0) * R
        for r in range(R):
            row = x_ref[pl.ds(r, 1), :]                               # (1, W)
            rolled = pltpu.roll(row, shift_ref[first + r], axis=1)
            # Per-row store; columns [Ctake:Cpad] (only possible when Cpad > W)
            # are never written -- the wrapper's lane slice discards them.
            o_ref[pl.ds(r, 1), :Ctake] = rolled[:, :Ctake]

    return kernel


# ---------------------------------------------------------------------------
# pallas_call wrappers
# ---------------------------------------------------------------------------

def _crop_windowed(x, row_idx, win_base, roll_shift, R, G, Cwin, Cpad):
    B, _ = x.shape
    return pl.pallas_call(
        _make_window_kernel(R, Cwin, Cpad),
        out_shape=jax.ShapeDtypeStruct((B, Cpad), x.dtype),
        grid_spec=pltpu.PrefetchScalarGridSpec(
            num_scalar_prefetch=3,
            grid=(G,),
            in_specs=[pl.BlockSpec(memory_space=pl.ANY)],   # x stays in HBM
            out_specs=pl.BlockSpec((R, Cpad), lambda g, rows, bases, shifts: (g, 0)),
            scratch_shapes=[
                pltpu.VMEM((R, Cwin), x.dtype),
                pltpu.SemaphoreType.DMA((R,)),
            ],
        ),
        compiler_params=pltpu.CompilerParams(
            dimension_semantics=("parallel",),
            vmem_limit_bytes=32 * 1024 * 1024,
        ),
    )(row_idx, win_base, roll_shift, x)


def _crop_fullrow(x, roll_shift, R, G, Cpad, vmem_limit_bytes):
    B, W = x.shape
    return pl.pallas_call(
        _make_fullrow_kernel(R, W, Cpad),
        out_shape=jax.ShapeDtypeStruct((B, Cpad), x.dtype),
        grid_spec=pltpu.PrefetchScalarGridSpec(
            num_scalar_prefetch=1,
            grid=(G,),
            in_specs=[pl.BlockSpec((R, W), lambda g, shifts: (g, 0))],
            out_specs=pl.BlockSpec((R, Cpad), lambda g, shifts: (g, 0)),
        ),
        compiler_params=pltpu.CompilerParams(
            dimension_semantics=("parallel",),
            vmem_limit_bytes=int(vmem_limit_bytes),
        ),
    )(roll_shift, x)


@functools.lru_cache(maxsize=None)
def _windowed_path_compiles(B, W, dtype_name, R, G, Cwin, Cpad):
    """Static, shape-keyed capability check for the manual-DMA path.

    Done with abstract shapes (jit-safe, cached), replacing the old runtime
    try/except which could not engage under an enclosing jax.jit."""
    try:
        i32 = jax.ShapeDtypeStruct((G * R,), jnp.int32)
        xs = jax.ShapeDtypeStruct((B, W), jnp.dtype(dtype_name))
        fn = functools.partial(_crop_windowed, R=R, G=G, Cwin=Cwin, Cpad=Cpad)
        jax.jit(fn).lower(xs, i32, i32, i32).compile()
        return True
    except Exception:   # Mosaic rejected the DMA form -> use full-row path.
        return False


def _pick_rows(B, rows_per_step, per_row_block_bytes, vmem_block_budget=8 << 20):
    """Rows per grid step: multiple of 8 (or == B), VMEM-budgeted, and G >= 2
    whenever B > 8 so the 'parallel' axis keeps both v7x TensorCores busy."""
    if B <= 8:
        return B, 1
    cap = max(8, vmem_block_budget // max(per_row_block_bytes, 1))
    half = _round_up(_cdiv(B, 2), 8)           # < B whenever B > 8  ->  G >= 2
    R = min(int(rows_per_step), cap, half)
    R = max(8, (R // 8) * 8)
    return R, _cdiv(B, R)


# ---------------------------------------------------------------------------
# Public wrapper (the module's forward pass)
# ---------------------------------------------------------------------------

def random_crop_audio(x, starts, crop_size, fill=0.0, rows_per_step=64,
                      windowed_min_ratio=4):
    """x: (B, W), starts: (B,) int32 in [0, W).  Returns (B, crop_size)."""
    B, W = x.shape
    C = int(crop_size)
    starts = starts.astype(jnp.int32)

    if C > W:
        # pad_if_needed degenerates: [fill]*(C-W) ++ row for every row,
        # independent of the random start -> pure padding, no kernel.
        pad = jnp.full((B, C - W), fill, dtype=x.dtype)
        return jnp.concatenate([pad, x], axis=1)

    itemsize = jnp.dtype(x.dtype).itemsize
    Cpad = _round_up(C, 128)          # lane-dense output width
    Cwin = Cpad + 128                 # fetched window per row (128-aligned base)

    # Manual per-row window DMA only when it saves a lot of HBM bytes; the op
    # is latency-bound, so near the crossover the auto-pipelined full-row
    # BlockSpec path (one big double-buffered DMA per step) wins.
    use_windowed = W >= max(int(windowed_min_ratio) * Cwin, Cwin)
    if use_windowed:
        per_row = (2 * Cpad + Cwin) * itemsize
        R, G = _pick_rows(B, rows_per_step, per_row)
        use_windowed = _windowed_path_compiles(
            B, W, jnp.dtype(x.dtype).name, R, G, Cwin, Cpad)

    if use_windowed:
        # Hoisted per-row scalar math (kernel body only does SMEM reads).
        # Tail rows of the last partial block clamp to row B-1 (wasted DMA in
        # the tail step only; their stores are clipped on writeback).
        row_idx = jnp.minimum(jnp.arange(G * R, dtype=jnp.int32), B - 1)
        s_eff = jnp.clip(starts, 0, W - C).astype(jnp.int32)[row_idx]
        win_base = jnp.clip((s_eff // 128) * 128, 0, W - Cwin).astype(jnp.int32)
        roll_shift = ((Cwin - (s_eff - win_base)) % Cwin).astype(jnp.int32)
        out = _crop_windowed(x, row_idx, win_base, roll_shift, R, G, Cwin, Cpad)
    else:
        per_row = 2 * (W + Cpad) * itemsize        # double-buffered in + out
        R, G = _pick_rows(B, rows_per_step, per_row)
        vmem_limit = max(32 << 20, 2 * R * (W + Cpad) * itemsize + (4 << 20))
        row_idx = jnp.minimum(jnp.arange(G * R, dtype=jnp.int32), B - 1)
        s_eff = jnp.clip(starts, 0, W - C).astype(jnp.int32)[row_idx]
        roll_shift = ((W - s_eff) % W).astype(jnp.int32)
        out = _crop_fullrow(x, roll_shift, R, G, Cpad, vmem_limit)

    # out is already (B, Cpad); only slice off the lane pad when needed.
    return out if C == Cpad else out[:, :C]


# ---------------------------------------------------------------------------
# Reference + tests
# ---------------------------------------------------------------------------

def _reference_crop(x, starts, C, fill=0.0):
    """Pure-numpy transcription of the torch forward (given the same starts)."""
    B, W = x.shape
    rows = []
    for i in range(B):
        s = int(starts[i])
        if s + C > W:
            pad = C + s - W
            row = np.concatenate([np.full((pad,), fill, dtype=x.dtype), x[i]])
            rows.append(row[s:s + C])
        else:
            rows.append(x[i, s:s + C])
    return np.stack(rows)


def _check(x, starts, C, fill=0.0):
    out = jax.block_until_ready(random_crop_audio(x, starts, C, fill=fill))
    assert out.shape == (x.shape[0], C), out.shape
    ref = _reference_crop(np.asarray(x), np.asarray(starts), C, fill=fill)
    np.testing.assert_allclose(np.asarray(out), ref, rtol=0, atol=0)


if __name__ == "__main__":
    keys = jax.random.split(jax.random.PRNGKey(0), 10)

    # 1) Full-row path: W < 4*Cwin, multi-step grid with a partial last block
    #    (B=40, R=24, G=2), non-128-multiple crop (lane slice exercised).
    x1 = jax.random.normal(keys[0], (40, 512), dtype=jnp.float32)
    s1 = jax.random.randint(keys[1], (40,), 0, 512, dtype=jnp.int32)
    _check(x1, s1, 200)

    # 2) Full-row path, crop nearly as wide as the row, tiny ragged batch.
    x2 = jax.random.normal(keys[2], (5, 384), dtype=jnp.float32)
    s2 = jax.random.randint(keys[3], (5,), 0, 384, dtype=jnp.int32)
    _check(x2, s2, 320)

    # 3) pad_if_needed degenerate case (crop wider than the audio, fill != 0).
    x3 = jax.random.normal(keys[4], (3, 96), dtype=jnp.float32)
    s3 = jax.random.randint(keys[5], (3,), 0, 96, dtype=jnp.int32)
    _check(x3, s3, 160, fill=1.5)

    # 4) Windowed manual-DMA path: W >= 4*Cwin, C == Cpad (no lane slice),
    #    partial last output block with clamped tail-row DMAs (B=24, R=16).
    x4 = jax.random.normal(keys[6], (24, 2048), dtype=jnp.float32)
    s4 = jax.random.randint(keys[7], (24,), 0, 2048, dtype=jnp.int32)
    _check(x4, s4, 256)

    # 5) Windowed path with a non-128-multiple crop (roll + lane-pad discard).
    x5 = jax.random.normal(keys[8], (12, 1664), dtype=jnp.float32)
    s5 = jax.random.randint(keys[9], (12,), 0, 1664, dtype=jnp.int32)
    _check(x5, s5, 200)

    print("KERNEL_OK")
</pallas_src>

<mosaic_0001>
module attributes {stable_mosaic.version = 11 : i64} {
  func.func @kernel(%arg0: i32, %arg1: memref<48xi32, #tpu.memory_space<smem>>, %arg2: memref<24x512xf32, #tpu.memory_space<vmem>>, %arg3: memref<24x256xf32, #tpu.memory_space<vmem>>) attributes {dimension_semantics = [#tpu.dimension_semantics<parallel>], iteration_bounds = array<i64: 2>, scalar_prefetch = 1 : i64, scratch_operands = 0 : i64, tpu.core_type = #tpu.core_type<tc>, window_params = [{transform_indices = @transform_0, window_bounds = array<i64: 24, 512>}, {transform_indices = @transform_1, window_bounds = array<i64: 24, 256>}]} {
    %c24_i32 = arith.constant 24 : i32
    %0 = arith.muli %arg0, %c24_i32 : i32
    %c0 = arith.constant 0 : index
    %c0_0 = arith.constant 0 : index
    %1 = vector.load %arg2[%c0, %c0_0] : memref<24x512xf32, #tpu.memory_space<vmem>>, vector<1x512xf32>
    %c0_i32 = arith.constant 0 : i32
    %2 = arith.addi %0, %c0_i32 : i32
    %3 = arith.index_cast %2 : i32 to index
    %4 = memref.load %arg1[%3] : memref<48xi32, #tpu.memory_space<smem>>
    %5 = tpu.dynamic_rotate %1 by %4 dim 1 : vector<1x512xf32>, i32 -> vector<1x512xf32>
    %6 = vector.extract_strided_slice %5 {offsets = [0, 0], sizes = [1, 256], strides = [1, 1]} : vector<1x512xf32> to vector<1x256xf32>
    %c0_1 = arith.constant 0 : index
    %c0_2 = arith.constant 0 : index
    %7 = vector.load %arg3[%c0_1, %c0_2] : memref<24x256xf32, #tpu.memory_space<vmem>>, vector<1x256xf32>
    tpu.vector_store %arg3[%c0_1, %c0_2], %6 {strides = array<i32>} : memref<24x256xf32, #tpu.memory_space<vmem>>, vector<1x256xf32>,
    %c1 = arith.constant 1 : index
    %c0_3 = arith.constant 0 : index
    %8 = vector.load %arg2[%c1, %c0_3] : memref<24x512xf32, #tpu.memory_space<vmem>>, vector<1x512xf32>
    %c1_i32 = arith.constant 1 : i32
    %9 = arith.addi %0, %c1_i32 : i32
    %10 = arith.index_cast %9 : i32 to index
    %11 = memref.load %arg1[%10] : memref<48xi32, #tpu.memory_space<smem>>
    %12 = tpu.dynamic_rotate %8 by %11 dim 1 : vector<1x512xf32>, i32 -> vector<1x512xf32>
    %13 = vector.extract_strided_slice %12 {offsets = [0, 0], sizes = [1, 256], strides = [1, 1]} : vector<1x512xf32> to vector<1x256xf32>
    %c1_4 = arith.constant 1 : index
    %c0_5 = arith.constant 0 : index
    %14 = vector.load %arg3[%c1_4, %c0_5] : memref<24x256xf32, #tpu.memory_space<vmem>>, vector<1x256xf32>
    tpu.vector_store %arg3[%c1_4, %c0_5], %13 {strides = array<i32>} : memref<24x256xf32, #tpu.memory_space<vmem>>, vector<1x256xf32>,
    %c2 = arith.constant 2 : index
    %c0_6 = arith.constant 0 : index
    %15 = vector.load %arg2[%c2, %c0_6] : memref<24x512xf32, #tpu.memory_space<vmem>>, vector<1x512xf32>
    %c2_i32 = arith.constant 2 : i32
    %16 = arith.addi %0, %c2_i32 : i32
    %17 = arith.index_cast %16 : i32 to index
    %18 = memref.load %arg1[%17] : memref<48xi32, #tpu.memory_space<smem>>
    %19 = tpu.dynamic_rotate %15 by %18 dim 1 : vector<1x512xf32>, i32 -> vector<1x512xf32>
    %20 = vector.extract_strided_slice %19 {offsets = [0, 0], sizes = [1, 256], strides = [1, 1]} : vector<1x512xf32> to vector<1x256xf32>
    %c2_7 = arith.constant 2 : index
    %c0_8 = arith.constant 0 : index
    %21 = vector.load %arg3[%c2_7, %c0_8] : memref<24x256xf32, #tpu.memory_space<vmem>>, vector<1x256xf32>
    tpu.vector_store %arg3[%c2_7, %c0_8], %20 {strides = array<i32>} : memref<24x256xf32, #tpu.memory_space<vmem>>, vector<1x256xf32>,
    %c3 = arith.constant 3 : index
    %c0_9 = arith.constant 0 : index
    %22 = vector.load %arg2[%c3, %c0_9] : memref<24x512xf32, #tpu.memory_space<vmem>>, vector<1x512xf32>
    %c3_i32 = arith.constant 3 : i32
    %23 = arith.addi %0, %c3_i32 : i32
    %24 = arith.index_cast %23 : i32 to index
    %25 = memref.load %arg1[%24] : memref<48xi32, #tpu.memory_space<smem>>
    %26 = tpu.dynamic_rotate %22 by %25 dim 1 : vector<1x512xf32>, i32 -> vector<1x512xf32>
    %27 = vector.extract_strided_slice %26 {offsets = [0, 0], sizes = [1, 256], strides = [1, 1]} : vector<1x512xf32> to vector<1x256xf32>
    %c3_10 = arith.constant 3 : index
    %c0_11 = arith.constant 0 : index
    %28 = vector.load %arg3[%c3_10, %c0_11] : memref<24x256xf32, #tpu.memory_space<vmem>>, vector<1x256xf32>
    tpu.vector_store %arg3[%c3_10, %c0_11], %27 {strides = array<i32>} : memref<24x256xf32, #tpu.memory_space<vmem>>, vector<1x256xf32>,
    %c4 = arith.constant 4 : index
    %c0_12 = arith.constant 0 : index
    %29 = vector.load %arg2[%c4, %c0_12] : memref<24x512xf32, #tpu.memory_space<vmem>>, vector<1x512xf32>
    %c4_i32 = arith.constant 4 : i32
    %30 = arith.addi %0, %c4_i32 : i32
    %31 = arith.index_cast %30 : i32 to index
    %32 = memref.load %arg1[%31] : memref<48xi32, #tpu.memory_space<smem>>
    %33 = tpu.dynamic_rotate %29 by %32 dim 1 : vector<1x512xf32>, i32 -> vector<1x512xf32>
    %34 = vector.extract_strided_slice %33 {offsets = [0, 0], sizes = [1, 256], strides = [1, 1]} : vector<1x512xf32> to vector<1x256xf32>
    %c4_13 = arith.constant 4 : index
    %c0_14 = arith.constant 0 : index
    %35 = vector.load %arg3[%c4_13, %c0_14] : memref<24x256xf32, #tpu.memory_space<vmem>>, vector<1x256xf32>
    tpu.vector_store %arg3[%c4_13, %c0_14], %34 {strides = array<i32>} : memref<24x256xf32, #tpu.memory_space<vmem>>, vector<1x256xf32>,
    %c5 = arith.constant 5 : index
    %c0_15 = arith.constant 0 : index
    %36 = vector.load %arg2[%c5, %c0_15] : memref<24x512xf32, #tpu.memory_space<vmem>>, vector<1x512xf32>
    %c5_i32 = arith.constant 5 : i32
    %37 = arith.addi %0, %c5_i32 : i32
    %38 = arith.index_cast %37 : i32 to index
    %39 = memref.load %arg1[%38] : memref<48xi32, #tpu.memory_space<smem>>
    %40 = tpu.dynamic_rotate %36 by %39 dim 1 : vector<1x512xf32>, i32 -> vector<1x512xf32>
    %41 = vector.extract_strided_slice %40 {offsets = [0, 0], sizes = [1, 256], strides = [1, 1]} : vector<1x512xf32> to vector<1x256xf32>
    %c5_16 = arith.constant 5 : index
    %c0_17 = arith.constant 0 : index
    %42 = vector.load %arg3[%c5_16, %c0_17] : memref<24x256xf32, #tpu.memory_space<vmem>>, vector<1x256xf32>
    tpu.vector_store %arg3[%c5_16, %c0_17], %41 {strides = array<i32>} : memref<24x256xf32, #tpu.memory_space<vmem>>, vector<1x256xf32>,
    %c6 = arith.constant 6 : index
    %c0_18 = arith.constant 0 : index
    %43 = vector.load %arg2[%c6, %c0_18] : memref<24x512xf32, #tpu.memory_space<vmem>>, vector<1x512xf32>
    %c6_i32 = arith.constant 6 : i32
    %44 = arith.addi %0, %c6_i32 : i32
    %45 = arith.index_cast %44 : i32 to index
    %46 = memref.load %arg1[%45] : memref<48xi32, #tpu.memory_space<smem>>
    %47 = tpu.dynamic_rotate %43 by %46 dim 1 : vector<1x512xf32>, i32 -> vector<1x512xf32>
    %48 = vector.extract_strided_slice %47 {offsets = [0, 0], sizes = [1, 256], strides = [1, 1]} : vector<1x512xf32> to vector<1x256xf32>
    %c6_19 = arith.constant 6 : index
    %c0_20 = arith.constant 0 : index
    %49 = vector.load %arg3[%c6_19, %c0_20] : memref<24x256xf32, #tpu.memory_space<vmem>>, vector<1x256xf32>
    tpu.vector_store %arg3[%c6_19, %c0_20], %48 {strides = array<i32>} : memref<24x256xf32, #tpu.memory_space<vmem>>, vector<1x256xf32>,
    %c7 = arith.constant 7 : index
    %c0_21 = arith.constant 0 : index
    %50 = vector.load %arg2[%c7, %c0_21] : memref<24x512xf32, #tpu.memory_space<vmem>>, vector<1x512xf32>
    %c7_i32 = arith.constant 7 : i32
    %51 = arith.addi %0, %c7_i32 : i32
    %52 = arith.index_cast %51 : i32 to index
    %53 = memref.load %arg1[%52] : memref<48xi32, #tpu.memory_space<smem>>
    %54 = tpu.dynamic_rotate %50 by %53 dim 1 : vector<1x512xf32>, i32 -> vector<1x512xf32>
    %55 = vector.extract_strided_slice %54 {offsets = [0, 0], sizes = [1, 256], strides = [1, 1]} : vector<1x512xf32> to vector<1x256xf32>
    %c7_22 = arith.constant 7 : index
    %c0_23 = arith.constant 0 : index
    %56 = vector.load %arg3[%c7_22, %c0_23] : memref<24x256xf32, #tpu.memory_space<vmem>>, vector<1x256xf32>
    tpu.vector_store %arg3[%c7_22, %c0_23], %55 {strides = array<i32>} : memref<24x256xf32, #tpu.memory_space<vmem>>, vector<1x256xf32>,
    %c8 = arith.constant 8 : index
    %c0_24 = arith.constant 0 : index
    %57 = vector.load %arg2[%c8, %c0_24] : memref<24x512xf32, #tpu.memory_space<vmem>>, vector<1x512xf32>
    %c8_i32 = arith.constant 8 : i32
    %58 = arith.addi %0, %c8_i32 : i32
    %59 = arith.index_cast %58 : i32 to index
    %60 = memref.load %arg1[%59] : memref<48xi32, #tpu.memory_space<smem>>
    %61 = tpu.dynamic_rotate %57 by %60 dim 1 : vector<1x512xf32>, i32 -> vector<1x512xf32>
    %62 = vector.extract_strided_slice %61 {offsets = [0, 0], sizes = [1, 256], strides = [1, 1]} : vector<1x512xf32> to vector<1x256xf32>
    %c8_25 = arith.constant 8 : index
    %c0_26 = arith.constant 0 : index
    %63 = vector.load %arg3[%c8_25, %c0_26] : memref<24x256xf32, #tpu.memory_space<vmem>>, vector<1x256xf32>
    tpu.vector_store %arg3[%c8_25, %c0_26], %62 {strides = array<i32>} : memref<24x256xf32, #tpu.memory_space<vmem>>, vector<1x256xf32>,
    %c9 = arith.constant 9 : index
    %c0_27 = arith.constant 0 : index
    %64 = vector.load %arg2[%c9, %c0_27] : memref<24x512xf32, #tpu.memory_space<vmem>>, vector<1x512xf32>
    %c9_i32 = arith.constant 9 : i32
    %65 = arith.addi %0, %c9_i32 : i32
    %66 = arith.index_cast %65 : i32 to index
    %67 = memref.load %arg1[%66] : memref<48xi32, #tpu.memory_space<smem>>
    %68 = tpu.dynamic_rotate %64 by %67 dim 1 : vector<1x512xf32>, i32 -> vector<1x512xf32>
    %69 = vector.extract_strided_slice %68 {offsets = [0, 0], sizes = [1, 256], strides = [1, 1]} : vector<1x512xf32> to vector<1x256xf32>
    %c9_28 = arith.constant 9 : index
    %c0_29 = arith.constant 0 : index
    %70 = vector.load %arg3[%c9_28, %c0_29] : memref<24x256xf32, #tpu.memory_space<vmem>>, vector<1x256xf32>
    tpu.vector_store %arg3[%c9_28, %c0_29], %69 {strides = array<i32>} : memref<24x256xf32, #tpu.memory_space<vmem>>, vector<1x256xf32>,
    %c10 = arith.constant 10 : index
    %c0_30 = arith.constant 0 : index
    %71 = vector.load %arg2[%c10, %c0_30] : memref<24x512xf32, #tpu.memory_space<vmem>>, vector<1x512xf32>
    %c10_i32 = arith.constant 10 : i32
    %72 = arith.addi %0, %c10_i32 : i32
    %73 = arith.index_cast %72 : i32 to index
    %74 = memref.load %arg1[%73] : memref<48xi32, #tpu.memory_space<smem>>
    %75 = tpu.dynamic_rotate %71 by %74 dim 1 : vector<1x512xf32>, i32 -> vector<1x512xf32>
    %76 = vector.extract_strided_slice %75 {offsets = [0, 0], sizes = [1, 256], strides = [1, 1]} : vector<1x512xf32> to vector<1x256xf32>
    %c10_31 = arith.constant 10 : index
    %c0_32 = arith.constant 0 : index
    %77 = vector.load %arg3[%c10_31, %c0_32] : memref<24x256xf32, #tpu.memory_space<vmem>>, vector<1x256xf32>
    tpu.vector_store %arg3[%c10_31, %c0_32], %76 {strides = array<i32>} : memref<24x256xf32, #tpu.memory_space<vmem>>, vector<1x256xf32>,
    %c11 = arith.constant 11 : index
    %c0_33 = arith.constant 0 : index
    %78 = vector.load %arg2[%c11, %c0_33] : memref<24x512xf32, #tpu.memory_space<vmem>>, vector<1x512xf32>
    %c11_i32 = arith.constant 11 : i32
    %79 = arith.addi %0, %c11_i32 : i32
    %80 = arith.index_cast %79 : i32 to index
    %81 = memref.load %arg1[%80] : memref<48xi32, #tpu.memory_space<smem>>
    %82 = tpu.dynamic_rotate %78 by %81 dim 1 : vector<1x512xf32>, i32 -> vector<1x512xf32>
    %83 = vector.extract_strided_slice %82 {offsets = [0, 0], sizes = [1, 256], strides = [1, 1]} : vector<1x512xf32> to vector<1x256xf32>
    %c11_34 = arith.constant 11 : index
    %c0_35 = arith.constant 0 : index
    %84 = vector.load %arg3[%c11_34, %c0_35] : memref<24x256xf32, #tpu.memory_space<vmem>>, vector<1x256xf32>
    tpu.vector_store %arg3[%c11_34, %c0_35], %83 {strides = array<i32>} : memref<24x256xf32, #tpu.memory_space<vmem>>, vector<1x256xf32>,
    %c12 = arith.constant 12 : index
    %c0_36 = arith.constant 0 : index
    %85 = vector.load %arg2[%c12, %c0_36] : memref<24x512xf32, #tpu.memory_space<vmem>>, vector<1x512xf32>
    %c12_i32 = arith.constant 12 : i32
    %86 = arith.addi %0, %c12_i32 : i32
    %87 = arith.index_cast %86 : i32 to index
    %88 = memref.load %arg1[%87] : memref<48xi32, #tpu.memory_space<smem>>
    %89 = tpu.dynamic_rotate %85 by %88 dim 1 : vector<1x512xf32>, i32 -> vector<1x512xf32>
    %90 = vector.extract_strided_slice %89 {offsets = [0, 0], sizes = [1, 256], strides = [1, 1]} : vector<1x512xf32> to vector<1x256xf32>
    %c12_37 = arith.constant 12 : index
    %c0_38 = arith.constant 0 : index
    %91 = vector.load %arg3[%c12_37, %c0_38] : memref<24x256xf32, #tpu.memory_space<vmem>>, vector<1x256xf32>
    tpu.vector_store %arg3[%c12_37, %c0_38], %90 {strides = array<i32>} : memref<24x256xf32, #tpu.memory_space<vmem>>, vector<1x256xf32>,
    %c13 = arith.constant 13 : index
    %c0_39 = arith.constant 0 : index
    %92 = vector.load %arg2[%c13, %c0_39] : memref<24x512xf32, #tpu.memory_space<vmem>>, vector<1x512xf32>
    %c13_i32 = arith.constant 13 : i32
    %93 = arith.addi %0, %c13_i32 : i32
    %94 = arith.index_cast %93 : i32 to index
    %95 = memref.load %arg1[%94] : memref<48xi32, #tpu.memory_space<smem>>
    %96 = tpu.dynamic_rotate %92 by %95 dim 1 : vector<1x512xf32>, i32 -> vector<1x512xf32>
    %97 = vector.extract_strided_slice %96 {offsets = [0, 0], sizes = [1, 256], strides = [1, 1]} : vector<1x512xf32> to vector<1x256xf32>
    %c13_40 = arith.constant 13 : index
    %c0_41 = arith.constant 0 : index
    %98 = vector.load %arg3[%c13_40, %c0_41] : memref<24x256xf32, #tpu.memory_space<vmem>>, vector<1x256xf32>
    tpu.vector_store %arg3[%c13_40, %c0_41], %97 {strides = array<i32>} : memref<24x256xf32, #tpu.memory_space<vmem>>, vector<1x256xf32>,
    %c14 = arith.constant 14 : index
    %c0_42 = arith.constant 0 : index
    %99 = vector.load %arg2[%c14, %c0_42] : memref<24x512xf32, #tpu.memory_space<vmem>>, vector<1x512xf32>
    %c14_i32 = arith.constant 14 : i32
    %100 = arith.addi %0, %c14_i32 : i32
    %101 = arith.index_cast %100 : i32 to index
    %102 = memref.load %arg1[%101] : memref<48xi32, #tpu.memory_space<smem>>
    %103 = tpu.dynamic_rotate %99 by %102 dim 1 : vector<1x512xf32>, i32 -> vector<1x512xf32>
    %104 = vector.extract_strided_slice %103 {offsets = [0, 0], sizes = [1, 256], strides = [1, 1]} : vector<1x512xf32> to vector<1x256xf32>
    %c14_43 = arith.constant 14 : index
    %c0_44 = arith.constant 0 : index
    %105 = vector.load %arg3[%c14_43, %c0_44] : memref<24x256xf32, #tpu.memory_space<vmem>>, vector<1x256xf32>
    tpu.vector_store %arg3[%c14_43, %c0_44], %104 {strides = array<i32>} : memref<24x256xf32, #tpu.memory_space<vmem>>, vector<1x256xf32>,
    %c15 = arith.constant 15 : index
    %c0_45 = arith.constant 0 : index
    %106 = vector.load %arg2[%c15, %c0_45] : memref<24x512xf32, #tpu.memory_space<vmem>>, vector<1x512xf32>
    %c15_i32 = arith.constant 15 : i32
    %107 = arith.addi %0, %c15_i32 : i32
    %108 = arith.index_cast %107 : i32 to index
    %109 = memref.load %arg1[%108] : memref<48xi32, #tpu.memory_space<smem>>
    %110 = tpu.dynamic_rotate %106 by %109 dim 1 : vector<1x512xf32>, i32 -> vector<1x512xf32>
    %111 = vector.extract_strided_slice %110 {offsets = [0, 0], sizes = [1, 256], strides = [1, 1]} : vector<1x512xf32> to vector<1x256xf32>
    %c15_46 = arith.constant 15 : index
    %c0_47 = arith.constant 0 : index
    %112 = vector.load %arg3[%c15_46, %c0_47] : memref<24x256xf32, #tpu.memory_space<vmem>>, vector<1x256xf32>
    tpu.vector_store %arg3[%c15_46, %c0_47], %111 {strides = array<i32>} : memref<24x256xf32, #tpu.memory_space<vmem>>, vector<1x256xf32>,
    %c16 = arith.constant 16 : index
    %c0_48 = arith.constant 0 : index
    %113 = vector.load %arg2[%c16, %c0_48] : memref<24x512xf32, #tpu.memory_space<vmem>>, vector<1x512xf32>
    %c16_i32 = arith.constant 16 : i32
    %114 = arith.addi %0, %c16_i32 : i32
    %115 = arith.index_cast %114 : i32 to index
    %116 = memref.load %arg1[%115] : memref<48xi32, #tpu.memory_space<smem>>
    %117 = tpu.dynamic_rotate %113 by %116 dim 1 : vector<1x512xf32>, i32 -> vector<1x512xf32>
    %118 = vector.extract_strided_slice %117 {offsets = [0, 0], sizes = [1, 256], strides = [1, 1]} : vector<1x512xf32> to vector<1x256xf32>
    %c16_49 = arith.constant 16 : index
    %c0_50 = arith.constant 0 : index
    %119 = vector.load %arg3[%c16_49, %c0_50] : memref<24x256xf32, #tpu.memory_space<vmem>>, vector<1x256xf32>
    tpu.vector_store %arg3[%c16_49, %c0_50], %118 {strides = array<i32>} : memref<24x256xf32, #tpu.memory_space<vmem>>, vector<1x256xf32>,
    %c17 = arith.constant 17 : index
    %c0_51 = arith.constant 0 : index
    %120 = vector.load %arg2[%c17, %c0_51] : memref<24x512xf32, #tpu.memory_space<vmem>>, vector<1x512xf32>
    %c17_i32 = arith.constant 17 : i32
    %121 = arith.addi %0, %c17_i32 : i32
    %122 = arith.index_cast %121 : i32 to index
    %123 = memref.load %arg1[%122] : memref<48xi32, #tpu.memory_space<smem>>
    %124 = tpu.dynamic_rotate %120 by %123 dim 1 : vector<1x512xf32>, i32 -> vector<1x512xf32>
    %125 = vector.extract_strided_slice %124 {offsets = [0, 0], sizes = [1, 256], strides = [1, 1]} : vector<1x512xf32> to vector<1x256xf32>
    %c17_52 = arith.constant 17 : index
    %c0_53 = arith.constant 0 : index
    %126 = vector.load %arg3[%c17_52, %c0_53] : memref<24x256xf32, #tpu.memory_space<vmem>>, vector<1x256xf32>
    tpu.vector_store %arg3[%c17_52, %c0_53], %125 {strides = array<i32>} : memref<24x256xf32, #tpu.memory_space<vmem>>, vector<1x256xf32>,
    %c18 = arith.constant 18 : index
    %c0_54 = arith.constant 0 : index
    %127 = vector.load %arg2[%c18, %c0_54] : memref<24x512xf32, #tpu.memory_space<vmem>>, vector<1x512xf32>
    %c18_i32 = arith.constant 18 : i32
    %128 = arith.addi %0, %c18_i32 : i32
    %129 = arith.index_cast %128 : i32 to index
    %130 = memref.load %arg1[%129] : memref<48xi32, #tpu.memory_space<smem>>
    %131 = tpu.dynamic_rotate %127 by %130 dim 1 : vector<1x512xf32>, i32 -> vector<1x512xf32>
    %132 = vector.extract_strided_slice %131 {offsets = [0, 0], sizes = [1, 256], strides = [1, 1]} : vector<1x512xf32> to vector<1x256xf32>
    %c18_55 = arith.constant 18 : index
    %c0_56 = arith.constant 0 : index
    %133 = vector.load %arg3[%c18_55, %c0_56] : memref<24x256xf32, #tpu.memory_space<vmem>>, vector<1x256xf32>
    tpu.vector_store %arg3[%c18_55, %c0_56], %132 {strides = array<i32>} : memref<24x256xf32, #tpu.memory_space<vmem>>, vector<1x256xf32>,
    %c19 = arith.constant 19 : index
    %c0_57 = arith.constant 0 : index
    %134 = vector.load %arg2[%c19, %c0_57] : memref<24x512xf32, #tpu.memory_space<vmem>>, vector<1x512xf32>
    %c19_i32 = arith.constant 19 : i32
    %135 = arith.addi %0, %c19_i32 : i32
    %136 = arith.index_cast %135 : i32 to index
    %137 = memref.load %arg1[%136] : memref<48xi32, #tpu.memory_space<smem>>
    %138 = tpu.dynamic_rotate %134 by %137 dim 1 : vector<1x512xf32>, i32 -> vector<1x512xf32>
    %139 = vector.extract_strided_slice %138 {offsets = [0, 0], sizes = [1, 256], strides = [1, 1]} : vector<1x512xf32> to vector<1x256xf32>
    %c19_58 = arith.constant 19 : index
    %c0_59 = arith.constant 0 : index
    %140 = vector.load %arg3[%c19_58, %c0_59] : memref<24x256xf32, #tpu.memory_space<vmem>>, vector<1x256xf32>
    tpu.vector_store %arg3[%c19_58, %c0_59], %139 {strides = array<i32>} : memref<24x256xf32, #tpu.memory_space<vmem>>, vector<1x256xf32>,
    %c20 = arith.constant 20 : index
    %c0_60 = arith.constant 0 : index
    %141 = vector.load %arg2[%c20, %c0_60] : memref<24x512xf32, #tpu.memory_space<vmem>>, vector<1x512xf32>
    %c20_i32 = arith.constant 20 : i32
    %142 = arith.addi %0, %c20_i32 : i32
    %143 = arith.index_cast %142 : i32 to index
    %144 = memref.load %arg1[%143] : memref<48xi32, #tpu.memory_space<smem>>
    %145 = tpu.dynamic_rotate %141 by %144 dim 1 : vector<1x512xf32>, i32 -> vector<1x512xf32>
    %146 = vector.extract_strided_slice %145 {offsets = [0, 0], sizes = [1, 256], strides = [1, 1]} : vector<1x512xf32> to vector<1x256xf32>
    %c20_61 = arith.constant 20 : index
    %c0_62 = arith.constant 0 : index
    %147 = vector.load %arg3[%c20_61, %c0_62] : memref<24x256xf32, #tpu.memory_space<vmem>>, vector<1x256xf32>
    tpu.vector_store %arg3[%c20_61, %c0_62], %146 {strides = array<i32>} : memref<24x256xf32, #tpu.memory_space<vmem>>, vector<1x256xf32>,
    %c21 = arith.constant 21 : index
    %c0_63 = arith.constant 0 : index
    %148 = vector.load %arg2[%c21, %c0_63] : memref<24x512xf32, #tpu.memory_space<vmem>>, vector<1x512xf32>
    %c21_i32 = arith.constant 21 : i32
    %149 = arith.addi %0, %c21_i32 : i32
    %150 = arith.index_cast %149 : i32 to index
    %151 = memref.load %arg1[%150] : memref<48xi32, #tpu.memory_space<smem>>
    %152 = tpu.dynamic_rotate %148 by %151 dim 1 : vector<1x512xf32>, i32 -> vector<1x512xf32>
    %153 = vector.extract_strided_slice %152 {offsets = [0, 0], sizes = [1, 256], strides = [1, 1]} : vector<1x512xf32> to vector<1x256xf32>
    %c21_64 = arith.constant 21 : index
    %c0_65 = arith.constant 0 : index
    %154 = vector.load %arg3[%c21_64, %c0_65] : memref<24x256xf32, #tpu.memory_space<vmem>>, vector<1x256xf32>
    tpu.vector_store %arg3[%c21_64, %c0_65], %153 {strides = array<i32>} : memref<24x256xf32, #tpu.memory_space<vmem>>, vector<1x256xf32>,
    %c22 = arith.constant 22 : index
    %c0_66 = arith.constant 0 : index
    %155 = vector.load %arg2[%c22, %c0_66] : memref<24x512xf32, #tpu.memory_space<vmem>>, vector<1x512xf32>
    %c22_i32 = arith.constant 22 : i32
    %156 = arith.addi %0, %c22_i32 : i32
    %157 = arith.index_cast %156 : i32 to index
    %158 = memref.load %arg1[%157] : memref<48xi32, #tpu.memory_space<smem>>
    %159 = tpu.dynamic_rotate %155 by %158 dim 1 : vector<1x512xf32>, i32 -> vector<1x512xf32>
    %160 = vector.extract_strided_slice %159 {offsets = [0, 0], sizes = [1, 256], strides = [1, 1]} : vector<1x512xf32> to vector<1x256xf32>
    %c22_67 = arith.constant 22 : index
    %c0_68 = arith.constant 0 : index
    %161 = vector.load %arg3[%c22_67, %c0_68] : memref<24x256xf32, #tpu.memory_space<vmem>>, vector<1x256xf32>
    tpu.vector_store %arg3[%c22_67, %c0_68], %160 {strides = array<i32>} : memref<24x256xf32, #tpu.memory_space<vmem>>, vector<1x256xf32>,
    %c23 = arith.constant 23 : index
    %c0_69 = arith.constant 0 : index
    %162 = vector.load %arg2[%c23, %c0_69] : memref<24x512xf32, #tpu.memory_space<vmem>>, vector<1x512xf32>
    %c23_i32 = arith.constant 23 : i32
    %163 = arith.addi %0, %c23_i32 : i32
    %164 = arith.index_cast %163 : i32 to index
    %165 = memref.load %arg1[%164] : memref<48xi32, #tpu.memory_space<smem>>
    %166 = tpu.dynamic_rotate %162 by %165 dim 1 : vector<1x512xf32>, i32 -> vector<1x512xf32>
    %167 = vector.extract_strided_slice %166 {offsets = [0, 0], sizes = [1, 256], strides = [1, 1]} : vector<1x512xf32> to vector<1x256xf32>
    %c23_70 = arith.constant 23 : index
    %c0_71 = arith.constant 0 : index
    %168 = vector.load %arg3[%c23_70, %c0_71] : memref<24x256xf32, #tpu.memory_space<vmem>>, vector<1x256xf32>
    tpu.vector_store %arg3[%c23_70, %c0_71], %167 {strides = array<i32>} : memref<24x256xf32, #tpu.memory_space<vmem>>, vector<1x256xf32>,
    return
  }
  func.func @transform_0(%arg0: i32, %arg1: memref<48xi32, #tpu.memory_space<smem>>) -> (i32, i32) {
    %c0_i32 = arith.constant 0 : i32
    %c0_i32_0 = arith.constant 0 : i32
    return %arg0, %c0_i32 : i32, i32
  }
  func.func @transform_1(%arg0: i32, %arg1: memref<48xi32, #tpu.memory_space<smem>>) -> (i32, i32) {
    %c0_i32 = arith.constant 0 : i32
    %c0_i32_0 = arith.constant 0 : i32
    return %arg0, %c0_i32 : i32, i32
  }
}

</mosaic_0001>

<bundles_post_ra>
// kernel: tpu_custom_call.1
= control target key start
LH: loop header
LB: loop body
LE: loop exit
PB: predicated region body
PF: predicated region fallthrough
CT: control target
= control target key end

     0   :  { %s3289_s0 = inlined_call_operand.hbm [shape: s32[48], index: 0, kind: input, shape index: {}]   ;;  %s3290_s1 = inlined_call_operand.hbm [shape: f32[40,512], index: 1, kind: input, shape index: {}]   ;;  %s3291_s2 = inlined_call_operand.hbm [shape: f32[40,256], index: 2, kind: output, shape index: {}]  }
   0x1   :  { %3336 = sst [smem:[#allocation30_spill]] %s3290_s1  ;;  %s2181_s11 = scalar_lea.hbm %s3289_s0, 16 }
   0x2   :  { %3337 = sst [smem:[#allocation31_spill]] %s3291_s2  ;;  %p2182_p0 = scmp.ne.s32.totalorder %s3289_s0, %s2181_s11 }
   0x3   :  { %p2185_p1 = scmp.lt.u32.totalorder %s2181_s11, %s3289_s0 }
   0x5   :  { %p2187_p2 = pnand %p2185_p1, %p2182_p0 }
   0x7   :  { %2190 = shalt.err (!%p2187_p2)  }
   0x8   :  { %s2289_s16 = smov [#allocation3]  }
   0x9   :  { %8 = dma.hbm_to_smem %s3289_s0, 16, %s2289_s16, [#allocation2] }
   0xa   :  { %2263 = dma.done.wait [#allocation2], 16 }
   0xb   :  { %2264 = vsyncadd [#allocation2], 4294967280 }
   0xc   :  { %10 = sfence }
   0xd   :  { %11 = vsyncpa [#allocation5], 0 }
   0xe   :  { %13 = vsyncpa [#allocation5 + $0x1], 0 }
   0xf   :  { %14 = vsyncpa [#allocation6], 0 }
  0x10   :  { %16 = vsyncpa [#allocation6 + $0x1], 0  ;;  %s2324_s19 = smov 0   ;;  %s2326_s20 = smov 0  }
  0x11   :  { %s2328_s21 = smov 0   ;;  %s2330_s22 = smov 0  }
  0x12 LB: > { %3338 = sst [smem:[#allocation11_spill]] %s2275_s19  ;;  %s2345_s0 = sadd.s32 4294967295, %s2287_s22   ;;  %s2287_s22 = sphi %s2330_s22, %s3407_s22   ;;  %s2283_s21 = sphi %s2328_s21, %s3410_s21   ;;  %s2279_s20 = sphi %s2326_s20, %s3409_s20   ;;  %s2275_s19 = sphi %s2324_s19, %s3408_s19  }
  0x13   : > { %3339 = sst [smem:[#allocation12_spill]] %s2279_s20  ;;  %s2059_s23 = sadd.s32 4294967294, %s2287_s22  }
  0x14   : > { %3340 = sst [smem:[#allocation13_spill]] %s2283_s21  ;;  %s2349_s24 = sadd.s32 1, %s2287_s22  }
  0x15   : > { %3341 = sst [smem:[#allocation14_spill]] %s2287_s22  ;;  %s29_s25 = sadd.s32 1, %s2283_s21 }
  0x16   : > { %3342 = sst [smem:[#allocation15_spill]] %s2345_s0  ;;  %s26_s26 = ssub.s32 %s2287_s22, %s2349_s24 }
  0x17   : > { %3343 = sst [smem:[#allocation16_spill]] %s2349_s24  ;;  %p36_p3 = scmp.ne.s32.totalorder %s2283_s21, %s2279_s20 }
  0x18   : > { %p27_p4 = scmp.eq.s32.totalorder %s26_s26, 0  ;;  %p37_p5 = scmp.eq.s32.totalorder %s2287_s22, 0 }
  0x19   : > { %p42_p6 = scmp.ne.s32.totalorder %s2279_s20, %s2275_s19  ;;  %p43_p7 = scmp.eq.s32.totalorder %s2345_s0, 0 }
  0x1a   : > { %s2361_s27 = scalar_select %p27_p4, %s2283_s21, %s29_s25  }
  0x1b   : > { %p38_p8 = por %p37_p5, %p36_p3  ;;  %p2363_p9 = por %p43_p7, %p42_p6 }
  0x1c   : > { %3344 = sst [smem:[#allocation17_spill]] %s2361_s27  ;;  %p66_p10 = scmp.eq.s32.totalorder %s2345_s0, 1 }
  0x1d   : > { %p72_p11 = scmp.eq.s32.totalorder %s2059_s23, 1  ;;  %p3292_p0 = scmp.ge.s32.totalorder %s2287_s22, 2 }
  0x1e   : > { %p2368_p12 = por %p66_p10, %p36_p3 }
  0x1f   : > { %p2372_p13 = por %p72_p11, %p42_p6  ;;  %88 = sbr.rel (%p3292_p0) target bundleno = 78 (0x4e), region = 16 }
  0x20   : > { %s3346_s29 = scalar_select %p2368_p12, 1, 0 }
  0x21   : > { %s3348_s30 = scalar_select %p2372_p13, 1, 0 }
  0x22   : > { %3347 = sst [smem:[#allocation18_spill]] %s3346_s29 }
  0x23   : > { %3349 = sst [smem:[#allocation19_spill]] %s3348_s30 }
  0x26   : > { %91 = sbr.rel (!%p38_p8) target bundleno = 78 (0x4e), region = 20  ;;  %s92_s3 = sand.u32 (%p38_p8), 1, %s2283_s21  }
  0x27   : > { %s97_s4 = smul.u32 (%p38_p8), 3, %s2287_s22  ;;  %s2384_s9 = scalar_lea.sflag (%p38_p8), [#allocation5], %s92_s3 }
  0x28   : > { %s2133_s5 = smul.u32 (%p38_p8), 96, %s92_s3 }
  0x29   : > { %s98_s6 = ssub.s32 (%p38_p8), 5, %s97_s4 }
  0x2a   : > { %p99_p1 = scmp.lt.s32.totalorder (%p38_p8), %s98_s6, 3  ;;  %s96_s10 = scalar_lea.vmem (%p38_p8), [#allocation4], %s2133_s5 }
  0x2d   : > { %s3412_s6 = smov (!%p99_p1, %s98_s6), 3 }
  0x2e   : > { %s2381_s7 = sshll.u32 %s3412_s6, 9 }
  0x2f   : > { %s104_s8 = ssub.s32 1536, %s2381_s7 }
  0x30   : > { %105 = vsyncadd %s2384_s9, %s104_s8  ;;  %p2064_p2 = scmp.ne.s32.totalorder %s2381_s7, 0  ;;  %s2131_s11 = smul.u32 1536, %s2287_s22 }
  0x31   : > { %s111_s12 = sshll.u32 %s96_s10, 4  ;;  %s3350_s1 = sld [smem:[#allocation30_spill]]  ;;  %s2394_s12 = int_to_ptr.vmem [resolvable:$true] %s111_s12 }
  0x37   : > { %s2392_s15 = scalar_lea.hbm %s3350_s1, %s2131_s11  ;;  %s2195_s23 = scalar_lea.hbm %s3350_s1, 2560 }
  0x38   : > { %s2191_s16 = scalar_lea.hbm %s2392_s15, %s2381_s7  ;;  %p2196_p6 = scmp.lt.u32.totalorder %s2392_s15, %s3350_s1 }
  0x39   : > { %p2192_p3 = scmp.ne.s32.totalorder %s2392_s15, %s2191_s16  ;;  %p2197_p7 = scmp.lt.u32.totalorder %s2195_s23, %s2191_s16 }
  0x3a   : > { %p2199_p10 = scmp.lt.u32.totalorder %s2191_s16, %s2392_s15 }
  0x3b   : > { %p2193_p4 = pnand %p2192_p3, %p2064_p2  ;;  %p2198_p8 = por %p2197_p7, %p2196_p6 }
  0x3d   : > { %p2194_p5 = pneg %p2193_p4  ;;  %p2200_p11 = por %p2199_p10, %p2198_p8 }
  0x3f   : > { %p2201_p1 = pnand %p2200_p11, %p2194_p5 }
  0x41   : > { %2204 = shalt.err (!%p2201_p1)
}
  0x42   : > { %s2205_s3 = scalar_lea.vmem %s2394_s12, %s2381_s7  ;;  %s2290_s4 = smov [#allocation4]  }
  0x43   : > { %p2206_p3 = scmp.ne.s32.totalorder %s2394_s12, %s2205_s3  ;;  %s2209_s5 = sshll.u32 %s2290_s4, 4  ;;  %s2210_s5 = int_to_ptr.vmem [resolvable:$false] %s2209_s5 }
  0x44   : > { %s2211_s6 = scalar_lea.vmem %s2210_s5, 3072  ;;  %p2212_p13 = scmp.lt.s32.totalorder %s2394_s12, %s2210_s5 }
  0x45   : > { %p2207_p4 = pnand %p2206_p3, %p2064_p2  ;;  %p2213_p6 = scmp.lt.s32.totalorder %s2211_s6, %s2205_s3 }
  0x47   : > { %p2208_p0 = pneg %p2207_p4  ;;  %p2214_p7 = por %p2213_p6, %p2212_p13 }
  0x49   : > { %p2215_p8 = pnand %p2214_p7, %p2208_p0 }
  0x4b   : > { %2218 = shalt.err (!%p2215_p8)
}
  0x4c   : > { %s2291_s8 = smov 512   ;;  %s2292_s10 = smov 32  }
  0x4d   : > { %117 = dma.hbm_to_vmem [thread:$0]  (%p2064_p2), %s2392_s15, %s2381_s7, %s2394_s12, %s2384_s9, %s2291_s8, %s2291_s8, %s2292_s10  }
  0x4e PF: > { %p2069_p5 = scmp.ge.s32.totalorder %s2287_s22, 1  ;;  %p119_p10 = scmp.lt.s32.totalorder %s2287_s22, 3 }
  0x50   : > { %p120_p11 = pnand %p2069_p5, %p119_p10 }
  0x52   : > { %123 = sbr.rel (%p120_p11) target bundleno = 447 (0x1bf), region = 24 }
  0x59   : > { %s2424_s11 = sand.u32 1, %s2279_s20  }
  0x5a   : > { %3351 = sst [smem:[#allocation20_spill]] %s2424_s11  ;;  %s2134_s13 = smul.u32 96, %s2424_s11 }
  0x5b   : > { %s126_s14 = scalar_lea.sflag [#allocation5], %s2424_s11 }
  0x5c   : > { %s2428_s16 = scalar_lea.vmem [#allocation4], %s2134_s13 }
  0x5d   : > { %2266 = dma.done.wait (%p2363_p9), %s126_s14, 1536  }
  0x5e   : > { %2268 = vsyncadd (%p2363_p9), %s126_s14, 4294965760  ;;  %s2435_s7 = smul.u32 24, %s2345_s0  ;;  %v164_v0 = vlaneseq  ;;  %v161_v6 = vld [vmem:[%s2428_s16] ss:$8 sm:$0xf] }
  0x5f   : > { %v2070_v11 = vld [vmem:[%s2428_s16 + $0x1] ss:$8 sm:$0xf]  ;;  %v2072_v16 = vld [vmem:[%s2428_s16 + $0x2] ss:$8 sm:$0xf] }
  0x60   : > { %s2438_s9 = sld [smem:[#allocation3 + %s2435_s7]]  ;;  %v2441_v1 = vshrl.u32 %v164_v0, 7  ;;  %s241_s12 = sadd.s32 1, %s2435_s7  ;;  %v2074_v21 = vld [vmem:[%s2428_s16 + $0x3] ss:$8 sm:$0xf] }
  0x61   : > { %s2450_s28 = sld [smem:[#allocation3 + %s241_s12]]  ;;  %s316_s18 = sadd.s32 2, %s2435_s7  ;;  %v2076_v26 = vld [vmem:[%s2428_s16 + $0x4] ss:$8 sm:$0xf]  ;;  %vm2767_vm4 = vcmp.lt.s32.totalorder %v164_v0, 256 }
  0x62   : > { %v2445_v2 = vsub.s32 2, %v2441_v1  ;;  %v2448_v3 = vsub.s32 0, %v2441_v1  ;;  %v2453_v4 = vsub.s32 3, %v2441_v1  ;;  %v2456_v5 = vsub.s32 1, %v2441_v1  ;;  %s2473_s25 = sld [smem:[#allocation3 + %s316_s18]]  ;;  %s391_s3 = sadd.s32 3, %s2435_s7 }
  0x63   : > { %s2490_s5 = sld [smem:[#allocation3 + %s391_s3]]  ;;  %s466_s8 = sadd.s32 4, %s2435_s7  ;;  %v2078_v31 = vld [vmem:[%s2428_s16 + $0x5] ss:$8 sm:$0xf] }
  0x64   : > { %v175_v7 = vrot.slane %v161_v6, %v2445_v2  ;;  %v167_v8 = vrot.slane %v161_v6, %v2448_v3  ;;  %v179_v9 = vrot.slane %v161_v6, %v2453_v4  ;;  %v171_v10 = vrot.slane %v161_v6, %v2456_v5  ;;  %s2507_s13 = sld [smem:[#allocation3 + %s466_s8]]  ;;  %s541_s12 = sadd.s32 5, %s2435_s7  ;;  %v2080_v36 = vld [vmem:[%s2428_s16 + $0x6] ss:$8 sm:$0xf] }
  0x65   : > { %v251_v12 = vrot.slane %v2070_v11, %v2456_v5  ;;  %v247_v13 = vrot.slane %v2070_v11, %v2448_v3  ;;  %v259_v14 = vrot.slane %v2070_v11, %v2453_v4  ;;  %v255_v15 = vrot.slane %v2070_v11, %v2445_v2  ;;  %s2524_s3 = sld [smem:[#allocation3 + %s541_s12]]  ;;  %s766_s1 = sadd.s32 8, %s2435_s7  ;;  %v2082_v41 = vld [vmem:[%s2428_s16 + $0x7] ss:$8 sm:$0xf] }
  0x66   : > { %s3297_s15 = sand.u32 511, %s2438_s9   ;;  %v326_v17 = vrot.slane %v2072_v16, %v2456_v5  ;;  %v322_v18 = vrot.slane %v2072_v16, %v2448_v3  ;;  %v334_v19 = vrot.slane %v2072_v16, %v2453_v4  ;;  %v330_v20 = vrot.slane %v2072_v16, %v2445_v2  ;;  %s2575_s27 = sld [smem:[#allocation3 + %s766_s1]]  ;;  %v2084_v46 = vld [vmem:[%s2428_s16 + $0x20] ss:$8 sm:$0xf] }
  0x67   : > { %s2464_s17 = sand.u32 127, %s3297_s15   ;;  %s3296_s23 = sand.u32 511, %s2450_s28   ;;  %v401_v22 = vrot.slane %v2074_v21, %v2456_v5  ;;  %v397_v23 = vrot.slane %v2074_v21, %v2448_v3  ;;  %v409_v24 = vrot.slane %v2074_v21, %v2453_v4  ;;  %v405_v25 = vrot.slane %v2074_v21, %v2445_v2  ;;  %v2086_v51 = vld [vmem:[%s2428_s16 + $0x21] ss:$8 sm:$0xf] }
  0x68   : > { %191 = vrot.lane.b32.xlu1 %v175_v7, %s2464_s17  ;;  %187 = vrot.lane.b32.xlu0 %v167_v8, %s2464_s17  ;;  %s2481_s26 = sand.u32 127, %s3296_s23   ;;  %s3294_s4 = sand.u32 511, %s2473_s25   ;;  %v476_v27 = vrot.slane %v2076_v26, %v2456_v5  ;;  %v472_v28 = vrot.slane %v2076_v26, %v2448_v3  ;;  %v484_v29 = vrot.slane %v2076_v26, %v2453_v4  ;;  %v2088_v56 = vld [vmem:[%s2428_s16 + $0x22] ss:$8 sm:$0xf] }
  0x69   : > { %s2498_s6 = sand.u32 127, %s3294_s4   ;;  %s3293_s10 = sand.u32 511, %s2490_s5   ;;  %v480_v30 = vrot.slane %v2076_v26, %v2445_v2  ;;  %v551_v32 = vrot.slane %v2078_v31, %v2456_v5  ;;  %v547_v33 = vrot.slane %v2078_v31, %v2448_v3  ;;  %v559_v34 = vrot.slane %v2078_v31, %v2453_v4  ;;  %v2090_v61 = vld [vmem:[%s2428_s16 + $0x23] ss:$8 sm:$0xf] }
  0x6a   : > { %s2515_s14 = sand.u32 127, %s3293_s10   ;;  %s3295_s18 = sand.u32 511, %s2507_s13   ;;  %v555_v35 = vrot.slane %v2078_v31, %v2445_v2  ;;  %v626_v37 = vrot.slane %v2080_v36, %v2456_v5  ;;  %v622_v38 = vrot.slane %v2080_v36, %v2448_v3  ;;  %v634_v39 = vrot.slane %v2080_v36, %v2453_v4  ;;  %v2092_v8 = vld [vmem:[%s2428_s16 + $0x24] ss:$8 sm:$0xf] }
  0x6b   : > { %s2532_s8 = sand.u32 127, %s3295_s18   ;;  %s616_s10 = sadd.s32 6, %s2435_s7  ;;  %v630_v40 = vrot.slane %v2080_v36, %v2445_v2  ;;  %v701_v42 = vrot.slane %v2082_v41, %v2456_v5  ;;  %v697_v43 = vrot.slane %v2082_v41, %v2448_v3  ;;  %v709_v44 = vrot.slane %v2082_v41, %v2453_v4 }
  0x6c   : > { %193 = vrot.lane.b32.xlu1 %v179_v9, %s2464_s17  ;;  %189 = vrot.lane.b32.xlu0 %v171_v10, %s2464_s17  ;;  %s3298_s12 = sand.u32 511, %s2524_s3   ;;  %s2541_s4 = sld [smem:[#allocation3 + %s616_s10]]  ;;  %v705_v45 = vrot.slane %v2082_v41, %v2445_v2  ;;  %v776_v47 = vrot.slane %v2084_v46, %v2456_v5  ;;  %v772_v48 = vrot.slane %v2084_v46, %v2448_v3  ;;  %v2293_v21 = vmov 1966171168  }
  0x6d   : > { %s2549_s18 = sand.u32 127, %s3298_s12   ;;  %s691_s23 = sadd.s32 7, %s2435_s7  ;;  %v784_v49 = vrot.slane %v2084_v46, %v2453_v4  ;;  %v780_v50 = vrot.slane %v2084_v46, %v2445_v2  ;;  %v851_v52 = vrot.slane %v2086_v51, %v2456_v5  ;;  %v847_v53 = vrot.slane %v2086_v51, %v2448_v3 }
  0x6e   : > { %s2558_s15 = sld [smem:[#allocation3 + %s691_s23]]  ;;  %s841_s21 = sadd.s32 9, %s2435_s7  ;;  %v859_v54 = vrot.slane %v2086_v51, %v2453_v4  ;;  %v855_v55 = vrot.slane %v2086_v51, %v2445_v2  ;;  %v926_v57 = vrot.slane %v2088_v56, %v2456_v5  ;;  %v922_v58 = vrot.slane %v2088_v56, %v2448_v3 }
  0x6f   : > { %s3306_s1 = sand.u32 511, %s2575_s27   ;;  %s2592_s20 = sld [smem:[#allocation3 + %s841_s21]]  ;;  %v934_v59 = vrot.slane %v2088_v56, %v2453_v4  ;;  %v930_v60 = vrot.slane %v2088_v56, %v2445_v2  ;;  %v1001_v62 = vrot.slane %v2090_v61, %v2456_v5  ;;  %v997_v63 = vrot.slane %v2090_v61, %v2448_v3 }
  0x70   : > { %269 = vrot.lane.b32.xlu1 %v251_v12, %s2481_s26  ;;  %267 = vrot.lane.b32.xlu0 %v247_v13, %s2481_s26  ;;  %s916_s24 = sadd.s32 10, %s2435_s7  ;;  %s991_s30 = sadd.s32 11, %s2435_s7  ;;  %v1009_v6 = vrot.slane %v2090_v61, %v2453_v4  ;;  %v1005_v7 = vrot.slane %v2090_v61, %v2445_v2  ;;  %v1076_v9 = vrot.slane %v2092_v8, %v2456_v5  ;;  %v2094_v13 = vld [vmem:[%s2428_s16 + $0x25] ss:$8 sm:$0xf]  ;;  %v195_v26 = vstv %s2464_s17 }
  0x71   : > { %s2609_s22 = sld [smem:[#allocation3 + %s916_s24]]  ;;  %s1066_s2 = sadd.s32 12, %s2435_s7  ;;  %v1072_v10 = vrot.slane %v2092_v8, %v2448_v3  ;;  %v1084_v11 = vrot.slane %v2092_v8, %v2453_v4  ;;  %v1080_v12 = vrot.slane %v2092_v8, %v2445_v2  ;;  %v1159_v16 = vrot.slane %v2094_v13, %v2453_v4 }
  0x72   : > { %s3299_s10 = sand.u32 511, %s2541_s4   ;;  %s2626_s19 = sld [smem:[#allocation3 + %s991_s30]] }
  0x73   : > { %s2566_s12 = sand.u32 127, %s3299_s10   ;;  %s2643_s0 = sld [smem:[#allocation3 + %s1066_s2]] }
  0x74   : > { %273 = vrot.lane.b32.xlu1 %v259_v14, %s2481_s26  ;;  %271 = vrot.lane.b32.xlu0 %v255_v15, %s2481_s26  ;;  %s3302_s23 = sand.u32 511, %s2558_s15   ;;  %s1141_s29 = sadd.s32 13, %s2435_s7  ;;  %v1151_v14 = vrot.slane %v2094_v13, %v2456_v5  ;;  %v1147_v15 = vrot.slane %v2094_v13, %v2448_v3 }
  0x75   : > { %s2583_s10 = sand.u32 127, %s3302_s23   ;;  %s2600_s23 = sand.u32 127, %s3306_s1  }
  0x76   : > { %s3309_s21 = sand.u32 511, %s2592_s20  }
  0x77   : > { %3352 = sst [smem:[#allocation21_spill]] %s2609_s22  ;;  %s2617_s1 = sand.u32 127, %s3309_s21  }
  0x78   : > { %344 = vrot.lane.b32.xlu1 %v326_v17, %s2498_s6  ;;  %342 = vrot.lane.b32.xlu0 %v322_v18, %s2498_s6  ;;  %3353 = sst [smem:[#allocation22_spill]] %s2617_s1  ;;  %s3313_s24 = sand.u32 511, %s2609_s22   ;;  %v1155_v17 = vrot.slane %v2094_v13, %v2445_v2  ;;  %v2096_v18 = vld [vmem:[%s2428_s16 + $0x26] ss:$8 sm:$0xf] }
  0x79   : > { %3354 = sst [smem:[#allocation23_spill]] %s2626_s19  ;;  %s2634_s21 = sand.u32 127, %s3313_s24  }
  0x7a   : > { %3355 = sst [smem:[#allocation24_spill]] %s2634_s21  ;;  %s3316_s30 = sand.u32 511, %s2626_s19  }
  0x7b   : > { %3356 = sst [smem:[#allocation25_spill]] %s2643_s0  ;;  %s2651_s24 = sand.u32 127, %s3316_s30  }
  0x7c   : > { %348 = vrot.lane.b32.xlu1 %v334_v19, %s2498_s6  ;;  %346 = vrot.lane.b32.xlu0 %v330_v20, %s2498_s6  ;;  %3357 = sst [smem:[#allocation26_spill]] %s2651_s24  ;;  %s3319_s2 = sand.u32 511, %s2643_s0   ;;  %v1226_v19 = vrot.slane %v2096_v18, %v2456_v5  ;;  %v1222_v20 = vrot.slane %v2096_v18, %v2448_v3 }
  0x7d   : > { %s2668_s30 = sand.u32 127, %s3319_s2   ;;  %s1216_s19 = sadd.s32 14, %s2435_s7 }
  0x7e   : > { %3359 = sst [smem:[#allocation28_spill]] %s2668_s30  ;;  %s1291_s0 = sadd.s32 15, %s2435_s7 }
  0x7f   : > { %s3361_s22 = sand.u32 511, %s2438_s9  }
  0x80   : > { %419 = vrot.lane.b32.xlu1 %v401_v22, %s2515_s14  ;;  %417 = vrot.lane.b32.xlu0 %v397_v23, %s2515_s14  ;;  %v219_v22 = vunpack.c.l.s4 %v2293_v21  ;;  %v1234_v23 = vrot.slane %v2096_v18, %v2453_v4 }
  0x84   : > { %423 = vrot.lane.b32.xlu1 %v409_v24, %s2515_s14  ;;  %421 = vrot.lane.b32.xlu0 %v405_v25, %s2515_s14  ;;  %v1230_v24 = vrot.slane %v2096_v18, %v2445_v2  ;;  %v2712_v25 = vand.u32 127, %v164_v0  ;;  %v2102_v18 = vld [vmem:[%s2428_s16 + $0x41] ss:$8 sm:$0xf] }
  0x86   : > { %vm198_vm0 = vcmp.lt.s32.totalorder %v2712_v25, %v195_v26  ;;  %v1451_v26 = vrot.slane %v2102_v18, %v2456_v5 }
  0x88   : > { %494 = vrot.lane.b32.xlu1 %v476_v27, %s2532_s8  ;;  %492 = vrot.lane.b32.xlu0 %v472_v28, %s2532_s8  ;;  %v2098_v27 = vld [vmem:[%s2428_s16 + $0x27] ss:$8 sm:$0xf]  ;;  %v220_v28 = vunpack.c.0.s8 %v219_v22 }
  0x8c   : > { %498 = vrot.lane.b32.xlu1 %v484_v29, %s2532_s8  ;;  %496 = vrot.lane.b32.xlu0 %v480_v30, %s2532_s8 }
  0x90   : > { %569 = vrot.lane.b32.xlu1 %v551_v32, %s2549_s18  ;;  %567 = vrot.lane.b32.xlu0 %v547_v33, %s2549_s18  ;;  %v1301_v33 = vrot.slane %v2098_v27, %v2456_v5 }
  0x94   : > { %573 = vrot.lane.b32.xlu1 %v559_v34, %s2549_s18  ;;  %571 = vrot.lane.b32.xlu0 %v555_v35, %s2549_s18  ;;  %v1297_v34 = vrot.slane %v2098_v27, %v2448_v3  ;;  %v2733_v35 = vsub.s32 %v220_v28, %v2441_v1 }
  0x98   : > { %644 = vrot.lane.b32.xlu1 %v626_v37, %s2566_s12  ;;  %642 = vrot.lane.b32.xlu0 %v622_v38, %s2566_s12  ;;  %v1309_v38 = vrot.slane %v2098_v27, %v2453_v4 }
  0x9c   : > { %648 = vrot.lane.b32.xlu1 %v634_v39, %s2566_s12  ;;  %646 = vrot.lane.b32.xlu0 %v630_v40, %s2566_s12 }
  0xa0   : > { %719 = vrot.lane.b32.xlu1 %v701_v42, %s2583_s10  ;;  %717 = vrot.lane.b32.xlu0 %v697_v43, %s2583_s10 }
  0xa4   : > { %723 = vrot.lane.b32.xlu1 %v709_v44, %s2583_s10  ;;  %721 = vrot.lane.b32.xlu0 %v705_v45, %s2583_s10 }
  0xa8   : > { %794 = vrot.lane.b32.xlu1 %v776_v47, %s2600_s23  ;;  %792 = vrot.lane.b32.xlu0 %v772_v48, %s2600_s23  ;;  %v275_v48 = vstv %s2481_s26 }
  0xa9   : > { %vm2760_vm3 = vcmp.lt.s32.totalorder %v2712_v25, %v275_v48 }
  0xac   : > { %798 = vrot.lane.b32.xlu1 %v784_v49, %s2600_s23  ;;  %796 = vrot.lane.b32.xlu0 %v780_v50, %s2600_s23  ;;  %v1305_v49 = vrot.slane %v2098_v27, %v2445_v2  ;;  %v2100_v50 = vld [vmem:[%s2428_s16 + $0x40] ss:$8 sm:$0xf]  ;;  %v1447_v27 = vrot.slane %v2102_v18, %v2448_v3 }
  0xad   : > { %v1384_v0 = vrot.slane %v2100_v50, %v2453_v4 }
  0xb0   : > { %869 = vrot.lane.b32.xlu1 %v851_v52, %s2617_s1  ;;  %867 = vrot.lane.b32.xlu0 %v847_v53, %s2617_s1 }
  0xb4   : > { %873 = vrot.lane.b32.xlu1 %v859_v54, %s2617_s1  ;;  %871 = vrot.lane.b32.xlu0 %v855_v55, %s2617_s1  ;;  %s1366_s1 = sadd.s32 16, %s2435_s7 }
  0xb8   : > { %944 = vrot.lane.b32.xlu1 %v926_v57, %s2634_s21  ;;  %942 = vrot.lane.b32.xlu0 %v922_v58, %s2634_s21  ;;  %v1376_v58 = vrot.slane %v2100_v50, %v2456_v5 }
  0xbc   : > { %948 = vrot.lane.b32.xlu1 %v934_v59, %s2634_s21  ;;  %946 = vrot.lane.b32.xlu0 %v930_v60, %s2634_s21  ;;  %s2660_s21 = sld [smem:[#allocation3 + %s1141_s29]]  ;;  %v1372_v60 = vrot.slane %v2100_v50, %v2448_v3 }
  0xc0   : > { %1019 = vrot.lane.b32.xlu1 %v1001_v62, %s2651_s24  ;;  %1017 = vrot.lane.b32.xlu0 %v997_v63, %s2651_s24 }
  0xc2   : > { %3358 = sst [smem:[#allocation27_spill]] %s2660_s21  ;;  %s3324_s29 = sand.u32 511, %s2660_s21  }
  0xc3   : > { %s2685_s2 = sand.u32 127, %s3324_s29   ;;  %s186_s21 = sshrl.u32 %s3361_s22, 7 }
  0xc4   : > { %1023 = vrot.lane.b32.xlu1 %v1009_v6, %s2651_s24  ;;  %1021 = vrot.lane.b32.xlu0 %v1005_v7, %s2651_s24  ;;  %s2677_s24 = sld [smem:[#allocation3 + %s1216_s19]]  ;;  %s210_s22 = sand.u32 2, %s186_s21 }
  0xc5   : > { %v211_v32 = vstv %s210_s22 }
  0xc6   : > { %vm212_vm2 = vcmp.ne.s32.totalorder %v211_v32, 0 }
  0xc8   : > { %1094 = vrot.lane.b32.xlu1 %v1076_v9, %s2668_s30  ;;  %1092 = vrot.lane.b32.xlu0 %v1072_v10, %s2668_s30 }
  0xca   : > { %3360 = sst [smem:[#allocation29_spill]] %s2677_s24  ;;  %s3326_s19 = sand.u32 511, %s2677_s24  }
  0xcb   : > { %s2704_s29 = sand.u32 127, %s3326_s19   ;;  %s3362_s19 = sand.u32 511, %s2450_s28  }
  0xcc   : > { %1098 = vrot.lane.b32.xlu1 %v1084_v11, %s2668_s30  ;;  %1096 = vrot.lane.b32.xlu0 %v1080_v12, %s2668_s30  ;;  %s2694_s30 = sld [smem:[#allocation3 + %s1291_s0]]  ;;  %s203_s0 = sand.u32 1, %s186_s21 }
  0xcd   : > { %v204_v31 = vstv %s203_s0  ;;  %s2717_s21 = sld [smem:[#allocation3 + %s1366_s1]]  ;;  %s2721_s24 = sshrl.u32 %s3362_s19, 7 }
  0xce   : > { %vm205_vm1 = vcmp.ne.s32.totalorder %v204_v31, 0  ;;  %s281_s28 = sand.u32 1, %s2721_s24  ;;  %s1441_s1 = sadd.s32 17, %s2435_s7  ;;  %v1459_v31 = vrot.slane %v2102_v18, %v2453_v4 }
  0xcf   : > { %s288_s19 = sand.u32 2, %s2721_s24  ;;  %v282_v54 = vstv %s281_s28  ;;  %s2752_s22 = sld [smem:[#allocation3 + %s1441_s1]] }
  0xd0   : > { %1169 = vrot.lane.b32.xlu1 %v1151_v14, %s2685_s2  ;;  %1167 = vrot.lane.b32.xlu0 %v1147_v15, %s2685_s2  ;;  %v289_v55 = vstv %s288_s19  ;;  %vm283_vm5 = vcmp.ne.s32.totalorder %v282_v54, 0  ;;  %s3368_s1 = smul.u32 48, %s2424_s11 }
  0xd1   : > { %vm290_vm6 = vcmp.ne.s32.totalorder %v289_v55, 0 }
  0xd2   : > { %s3328_s9 = sand.u32 511, %s2694_s30   ;;  %s2792_s19 = scalar_lea.vmem [#allocation7], %s3368_s1 }
  0xd3   : > { %s2729_s17 = sand.u32 127, %s3328_s9   ;;  %s3329_s24 = sand.u32 511, %s2717_s21  }
  0xd4   : > { %1173 = vrot.lane.b32.xlu1 %v1159_v16, %s2685_s2  ;;  %1171 = vrot.lane.b32.xlu0 %v1155_v17, %s2685_s2  ;;  %s3363_s9 = sand.u32 511, %s2473_s25   ;;  %s2774_s25 = sand.u32 127, %s3329_s24   ;;  %v350_v16 = vstv %s2498_s6  ;;  %v1380_v17 = vrot.slane %v2100_v50, %v2445_v2 }
  0xd5   : > { %s2756_s0 = sshrl.u32 %s3363_s9, 7  ;;  %s1516_s9 = sadd.s32 18, %s2435_s7  ;;  %vm351_vm7 = vcmp.lt.s32.totalorder %v2712_v25, %v350_v16 }
  0xd6   : > { %s356_s26 = sand.u32 1, %s2756_s0  ;;  %s363_s28 = sand.u32 2, %s2756_s0 }
  0xd7   : > { %v357_v22 = vstv %s356_s26  ;;  %s3332_s0 = sand.u32 511, %s2752_s22   ;;  %s2809_s1 = sld [smem:[#allocation3 + %s1516_s9]] }
  0xd8   : > { %1244 = vrot.lane.b32.xlu1 %v1226_v19, %s2704_s29  ;;  %1242 = vrot.lane.b32.xlu0 %v1222_v20, %s2704_s29  ;;  %s3369_s24 = sand.u32 511, %s2490_s5   ;;  %vm358_vm8 = vcmp.ne.s32.totalorder %v357_v22, 0  ;;  %s2822_s6 = sand.u32 127, %s3332_s0  }
  0xd9   : > { %s2813_s11 = sshrl.u32 %s3369_s24, 7  ;;  %s1591_s24 = sadd.s32 19, %s2435_s7 }
  0xda   : > { %v192_v29 = vpop.permute.xlu1 %191  ;;  %v188_v30 = vpop.permute.xlu0 %187  ;;  %s431_s5 = sand.u32 1, %s2813_s11  ;;  %s438_s26 = sand.u32 2, %s2813_s11 }
  0xdb   : > { %v432_v48 = vstv %s431_s5  ;;  %s2845_s9 = sld [smem:[#allocation3 + %s1591_s24]]  ;;  %s1666_s5 = sadd.s32 20, %s2435_s7 }
  0xdc   : > { %1248 = vrot.lane.b32.xlu1 %v1234_v23, %s2704_s29  ;;  %1246 = vrot.lane.b32.xlu0 %v1230_v24, %s2704_s29  ;;  %v364_v23 = vstv %s363_s28  ;;  %s3370_s28 = sand.u32 511, %s2507_s13   ;;  %vm433_vm11 = vcmp.ne.s32.totalorder %v432_v48, 0 }
  0xdd   : > { %vm365_vm9 = vcmp.ne.s32.totalorder %v364_v23, 0  ;;  %s3333_s11 = sand.u32 511, %s2809_s1   ;;  %s2849_s0 = sshrl.u32 %s3370_s28, 7 }
  0xde   : > { %v194_v36 = vpop.permute.xlu1 %193  ;;  %v190_v37 = vpop.permute.xlu0 %189  ;;  %s506_s13 = sand.u32 1, %s2849_s0  ;;  %s513_s24 = sand.u32 2, %s2849_s0 }
  0xdf   : > { %v199_v39 = vsel %vm198_vm0, %v192_v29, %v194_v36  ;;  %v202_v40 = vsel %vm198_vm0, %v194_v36, %v188_v30  ;;  %v200_v41 = vsel %vm198_vm0, %v190_v37, %v192_v29  ;;  %v201_v42 = vsel %vm198_vm0, %v188_v30, %v190_v37  ;;  %s3371_s28 = sand.u32 511, %s2524_s3  }
  0xe0   : > { %v206_v1 = vsel %vm205_vm1, %v199_v39, %v202_v40  ;;  %v207_v43 = vsel %vm205_vm1, %v202_v40, %v201_v42  ;;  %v208_v44 = vsel %vm205_vm1, %v201_v42, %v200_v41  ;;  %v209_v45 = vsel %vm205_vm1, %v200_v41, %v199_v39  ;;  %1319 = vrot.lane.b32.xlu1 %v1301_v33, %s2729_s17 }
  0xe1   : > { %v213_v46 = vsel %vm212_vm2, %v208_v44, %v206_v1  ;;  %v214_v47 = vsel %vm212_vm2, %v209_v45, %v207_v43  ;;  %1317 = vrot.lane.b32.xlu0 %v1297_v34, %s2729_s17  ;;  %v425_v1 = vstv %s2515_s14  ;;  %v1455_v43 = vrot.slane %v2102_v18, %v2445_v2  ;;  %v2104_v44 = vld [vmem:[%s2428_s16 + $0x42] ss:$8 sm:$0xf]  ;;  %s2858_s14 = sand.u32 127, %s3333_s11   ;;  %s3334_s0 = sand.u32 511, %s2845_s9  }
  0xe2   : > { %v217_v51 = vcombine.low %v213_v46, %v214_v47  ;;  %v270_v52 = vpop.permute.xlu1 %269  ;;  %v268_v53 = vpop.permute.xlu0 %267  ;;  %vm426_vm10 = vcmp.lt.s32.totalorder %v2712_v25, %v425_v1  ;;  %v514_v16 = vstv %s513_s24  ;;  %s2885_s11 = sshrl.u32 %s3371_s28, 7  ;;  %s3372_s28 = sand.u32 511, %s2541_s4  }
  0xe3   : > { %v279_v6 = vsel %vm2760_vm3, %v268_v53, %v270_v52  ;;  %vm515_vm15 = vcmp.ne.s32.totalorder %v514_v16, 0  ;;  %s581_s3 = sand.u32 1, %s2885_s11 }
  0xe4   : > { %v224_v56 = vrot.slane %v217_v51, %v2733_v35  ;;  %1323 = vrot.lane.b32.xlu1 %v1309_v38, %s2729_s17  ;;  %v1526_v51 = vrot.slane %v2104_v44, %v2456_v5 }
  0xe5   : > { %1321 = vrot.lane.b32.xlu0 %v1305_v49, %s2729_s17  ;;  %v439_v49 = vstv %s438_s26  ;;  %s2881_s26 = sld [smem:[#allocation3 + %s1666_s5]]  ;;  %s588_s5 = sand.u32 2, %s2885_s11 }
  0xe6   : > { %v231_v61 = vrot.slane %v224_v56, %v2733_v35  ;;  %v274_v62 = vpop.permute.xlu1 %273  ;;  %v272_v63 = vpop.permute.xlu0 %271  ;;  %vm440_vm12 = vcmp.ne.s32.totalorder %v439_v49, 0  ;;  %v1534_v56 = vrot.slane %v2104_v44, %v2453_v4  ;;  %v589_v1 = vstv %s588_s5 }
  0xe7   : > { %v280_v7 = vsel %vm2760_vm3, %v274_v62, %v268_v53  ;;  %v277_v8 = vsel %vm2760_vm3, %v272_v63, %v274_v62  ;;  %v278_v9 = vsel %vm2760_vm3, %v270_v52, %v272_v63  ;;  %v1522_v52 = vrot.slane %v2104_v44, %v2448_v3 }
  0xe8   : > { %237 = vst.msk [vmem:[%s2792_s19] ss:$8 sm:$0x3] %vm2767_vm4, %v231_v61  ;;  %v285_v10 = vsel %vm283_vm5, %v280_v7, %v279_v6  ;;  %v284_v11 = vsel %vm283_vm5, %v277_v8, %v280_v7  ;;  %v286_v12 = vsel %vm283_vm5, %v279_v6, %v278_v9  ;;  %v287_v13 = vsel %vm283_vm5, %v278_v9, %v277_v8 }
  0xe9   : > { %1394 = vrot.lane.b32.xlu1 %v1376_v58, %s2774_s25  ;;  %v291_v14 = vsel %vm290_vm6, %v286_v12, %v284_v11  ;;  %v292_v15 = vsel %vm290_vm6, %v287_v13, %v285_v10  ;;  %1392 = vrot.lane.b32.xlu0 %v1372_v60, %s2774_s25  ;;  %v500_v9 = vstv %s2532_s8  ;;  %v1530_v10 = vrot.slane %v2104_v44, %v2445_v2  ;;  %v2106_v11 = vld [vmem:[%s2428_s16 + $0x43] ss:$8 sm:$0xf]  ;;  %s2894_s8 = sand.u32 127, %s3334_s0   ;;  %s2921_s0 = sshrl.u32 %s3372_s28, 7 }
  0xea   : > { %v295_v19 = vcombine.low %v291_v14, %v292_v15  ;;  %v345_v20 = vpop.permute.xlu1 %344  ;;  %v343_v21 = vpop.permute.xlu0 %342  ;;  %v507_v15 = vstv %s506_s13  ;;  %vm501_vm13 = vcmp.lt.s32.totalorder %v2712_v25, %v500_v9  ;;  %v1601_v18 = vrot.slane %v2106_v11, %v2456_v5  ;;  %s1741_s13 = sadd.s32 21, %s2435_s7  ;;  %s656_s4 = sand.u32 1, %s2921_s0 }
  0xeb   : > { %v354_v32 = vsel %vm351_vm7, %v343_v21, %v345_v20  ;;  %vm508_vm14 = vcmp.ne.s32.totalorder %v507_v15, 0  ;;  %v1609_v23 = vrot.slane %v2106_v11, %v2453_v4  ;;  %s3335_s11 = sand.u32 511, %s2881_s26   ;;  %s2917_s24 = sld [smem:[#allocation3 + %s1741_s13]]  ;;  %vm590_vm2 = vcmp.ne.s32.totalorder %v589_v1, 0 }
  0xec   : > { %v302_v24 = vrot.slane %v295_v19, %v2733_v35  ;;  %v1597_v19 = vrot.slane %v2106_v11, %v2448_v3  ;;  %s663_s13 = sand.u32 2, %s2921_s0  ;;  %s3373_s28 = sand.u32 511, %s2558_s15  }
  0xed   : > { %1398 = vrot.lane.b32.xlu1 %v1384_v0, %s2774_s25  ;;  %1396 = vrot.lane.b32.xlu0 %v1380_v17, %s2774_s25  ;;  %v664_v9 = vstv %s663_s13  ;;  %s3374_s13 = sand.u32 511, %s2575_s27  }
  0xee   : > { %v309_v28 = vrot.slane %v302_v24, %v2733_v35  ;;  %v349_v29 = vpop.permute.xlu1 %348  ;;  %v347_v30 = vpop.permute.xlu0 %346  ;;  %vm665_vm6 = vcmp.ne.s32.totalorder %v664_v9, 0 }
  0xef   : > { %v355_v33 = vsel %vm351_vm7, %v349_v29, %v343_v21  ;;  %v352_v34 = vsel %vm351_vm7, %v347_v30, %v349_v29  ;;  %v353_v36 = vsel %vm351_vm7, %v345_v20, %v347_v30 }
  0xf0   : > { %2071 = vst.msk [vmem:[%s2792_s19 + $0x1] ss:$8 sm:$0x3] %vm2767_vm4, %v309_v28  ;;  %v360_v37 = vsel %vm358_vm8, %v355_v33, %v354_v32  ;;  %v359_v38 = vsel %vm358_vm8, %v352_v34, %v355_v33  ;;  %v361_v39 = vsel %vm358_vm8, %v354_v32, %v353_v36  ;;  %v362_v40 = vsel %vm358_vm8, %v353_v36, %v352_v34 }
  0xf1   : > { %1469 = vrot.lane.b32.xlu1 %v1451_v26, %s2822_s6  ;;  %v366_v41 = vsel %vm365_vm9, %v361_v39, %v359_v38  ;;  %v367_v42 = vsel %vm365_vm9, %v362_v40, %v360_v37  ;;  %1467 = vrot.lane.b32.xlu0 %v1447_v27, %s2822_s6  ;;  %v575_v36 = vstv %s2549_s18  ;;  %v1605_v37 = vrot.slane %v2106_v11, %v2445_v2  ;;  %v2108_v38 = vld [vmem:[%s2428_s16 + $0x44] ss:$8 sm:$0xf]  ;;  %s2930_s18 = sand.u32 127, %s3335_s11   ;;  %s1764_s0 = sand.u32 511, %s2917_s24  }
  0xf2   : > { %v370_v45 = vcombine.low %v366_v41, %v367_v42  ;;  %v420_v46 = vpop.permute.xlu1 %419  ;;  %v418_v47 = vpop.permute.xlu0 %417  ;;  %v582_v42 = vstv %s581_s3  ;;  %vm576_vm0 = vcmp.lt.s32.totalorder %v2712_v25, %v575_v36  ;;  %v1676_v44 = vrot.slane %v2108_v38, %v2456_v5  ;;  %s1816_s3 = sadd.s32 22, %s2435_s7  ;;  %s2957_s11 = sshrl.u32 %s3373_s28, 7 }
  0xf3   : > { %v429_v57 = vsel %vm426_vm10, %v418_v47, %v420_v46  ;;  %vm583_vm1 = vcmp.ne.s32.totalorder %v582_v42, 0  ;;  %v1684_v49 = vrot.slane %v2108_v38, %v2453_v4  ;;  %s2953_s5 = sld [smem:[#allocation3 + %s1816_s3]]  ;;  %s731_s15 = sand.u32 1, %s2957_s11 }
  0xf4   : > { %v377_v50 = vrot.slane %v370_v45, %v2733_v35  ;;  %v1672_v45 = vrot.slane %v2108_v38, %v2448_v3  ;;  %s738_s3 = sand.u32 2, %s2957_s11  ;;  %s2993_s28 = sshrl.u32 %s3374_s13, 7 }
  0xf5   : > { %1473 = vrot.lane.b32.xlu1 %v1459_v31, %s2822_s6  ;;  %1471 = vrot.lane.b32.xlu0 %v1455_v43, %s2822_s6  ;;  %v739_v36 = vstv %s738_s3  ;;  %s806_s27 = sand.u32 1, %s2993_s28  ;;  %s3375_s3 = sand.u32 511, %s2592_s20  }
  0xf6   : > { %v384_v53 = vrot.slane %v377_v50, %v2733_v35  ;;  %v424_v54 = vpop.permute.xlu1 %423  ;;  %v422_v55 = vpop.permute.xlu0 %421  ;;  %vm740_vm9 = vcmp.ne.s32.totalorder %v739_v36, 0  ;;  %s3026_s13 = sshrl.u32 %s3375_s3, 7  ;;  %s3376_s20 = sld [smem:[#allocation22_spill]] }
  0xf7   : > { %v430_v58 = vsel %vm426_vm10, %v424_v54, %v418_v47  ;;  %v427_v60 = vsel %vm426_vm10, %v422_v55, %v424_v54  ;;  %v428_v61 = vsel %vm426_vm10, %v420_v46, %v422_v55 }
  0xf8   : > { %2073 = vst.msk [vmem:[%s2792_s19 + $0x2] ss:$8 sm:$0x3] %vm2767_vm4, %v384_v53  ;;  %v435_v62 = vsel %vm433_vm11, %v430_v58, %v429_v57  ;;  %v434_v63 = vsel %vm433_vm11, %v427_v60, %v430_v58  ;;  %v436_v0 = vsel %vm433_vm11, %v429_v57, %v428_v61  ;;  %v437_v6 = vsel %vm433_vm11, %v428_v61, %v427_v60 }
  0xf9   : > { %1544 = vrot.lane.b32.xlu1 %v1526_v51, %s2858_s14  ;;  %v441_v7 = vsel %vm440_vm12, %v436_v0, %v434_v63  ;;  %v442_v8 = vsel %vm440_vm12, %v437_v6, %v435_v62  ;;  %1542 = vrot.lane.b32.xlu0 %v1522_v52, %s2858_s14  ;;  %v650_v61 = vstv %s2566_s12  ;;  %v1680_v62 = vrot.slane %v2108_v38, %v2445_v2  ;;  %v2110_v63 = vld [vmem:[%s2428_s16 + $0x45] ss:$8 sm:$0xf]  ;;  %s2966_s12 = sand.u32 127, %s1764_s0  }
  0xfa   : > { %v445_v12 = vcombine.low %v441_v7, %v442_v8  ;;  %v495_v13 = vpop.permute.xlu1 %494  ;;  %v493_v14 = vpop.permute.xlu0 %492  ;;  %v657_v8 = vstv %s656_s4  ;;  %vm651_vm3 = vcmp.lt.s32.totalorder %v2712_v25, %v650_v61  ;;  %v1751_v11 = vrot.slane %v2110_v63, %v2456_v5  ;;  %s1891_s4 = sadd.s32 23, %s2435_s7  ;;  %s1839_s7 = sand.u32 511, %s2953_s5  }
  0xfb   : > { %v504_v24 = vsel %vm501_vm13, %v493_v14, %v495_v13  ;;  %vm658_vm5 = vcmp.ne.s32.totalorder %v657_v8, 0  ;;  %v1759_v16 = vrot.slane %v2110_v63, %v2453_v4  ;;  %s2989_s11 = sld [smem:[#allocation3 + %s1891_s4]] }
  0xfc   : > { %v452_v17 = vrot.slane %v445_v12, %v2733_v35  ;;  %v1747_v12 = vrot.slane %v2110_v63, %v2448_v3 }
  0xfd   : > { %1548 = vrot.lane.b32.xlu1 %v1534_v56, %s2858_s14  ;;  %1546 = vrot.lane.b32.xlu0 %v1530_v10, %s2858_s14 }
  0xfe   : > { %v459_v20 = vrot.slane %v452_v17, %v2733_v35  ;;  %v499_v21 = vpop.permute.xlu1 %498  ;;  %v497_v22 = vpop.permute.xlu0 %496 }
  0xff   : > { %v505_v26 = vsel %vm501_vm13, %v499_v21, %v493_v14  ;;  %v502_v27 = vsel %vm501_vm13, %v497_v22, %v499_v21  ;;  %v503_v28 = vsel %vm501_vm13, %v495_v13, %v497_v22 }
 0x100   : > { %2075 = vst.msk [vmem:[%s2792_s19 + $0x3] ss:$8 sm:$0x3] %vm2767_vm4, %v459_v20  ;;  %v510_v29 = vsel %vm508_vm14, %v505_v26, %v504_v24  ;;  %v509_v30 = vsel %vm508_vm14, %v502_v27, %v505_v26  ;;  %v511_v31 = vsel %vm508_vm14, %v504_v24, %v503_v28  ;;  %v512_v32 = vsel %vm508_vm14, %v503_v28, %v502_v27 }
 0x101   : > { %1619 = vrot.lane.b32.xlu1 %v1601_v18, %s2894_s8  ;;  %v516_v33 = vsel %vm515_vm15, %v511_v31, %v509_v30  ;;  %v517_v34 = vsel %vm515_vm15, %v512_v32, %v510_v29  ;;  %1617 = vrot.lane.b32.xlu0 %v1597_v19, %s2894_s8  ;;  %v725_v28 = vstv %s2583_s10  ;;  %v1755_v29 = vrot.slane %v2110_v63, %v2445_v2  ;;  %v2112_v30 = vld [vmem:[%s2428_s16 + $0x46] ss:$8 sm:$0xf]  ;;  %s3002_s10 = sand.u32 127, %s1839_s7   ;;  %s1914_s4 = sand.u32 511, %s2989_s11  }
 0x102   : > { %v520_v39 = vcombine.low %v516_v33, %v517_v34  ;;  %v570_v40 = vpop.permute.xlu1 %569  ;;  %v568_v41 = vpop.permute.xlu0 %567  ;;  %v732_v34 = vstv %s731_s15  ;;  %vm726_vm7 = vcmp.lt.s32.totalorder %v2712_v25, %v725_v28  ;;  %v1826_v38 = vrot.slane %v2112_v30, %v2456_v5  ;;  %s813_s15 = sand.u32 2, %s2993_s28  ;;  %s888_s28 = sand.u32 2, %s3026_s13 }
 0x103   : > { %v579_v50 = vsel %vm576_vm0, %v568_v41, %v570_v40  ;;  %vm733_vm8 = vcmp.ne.s32.totalorder %v732_v34, 0  ;;  %v1834_v1 = vrot.slane %v2112_v30, %v2453_v4  ;;  %v814_v61 = vstv %s813_s15 }
 0x104   : > { %v527_v43 = vrot.slane %v520_v39, %v2733_v35  ;;  %v1822_v39 = vrot.slane %v2112_v30, %v2448_v3  ;;  %vm815_vm12 = vcmp.ne.s32.totalorder %v814_v61, 0 }
 0x105   : > { %1623 = vrot.lane.b32.xlu1 %v1609_v23, %s2894_s8  ;;  %1621 = vrot.lane.b32.xlu0 %v1605_v37, %s2894_s8 }
 0x106   : > { %v534_v46 = vrot.slane %v527_v43, %v2733_v35  ;;  %v574_v47 = vpop.permute.xlu1 %573  ;;  %v572_v48 = vpop.permute.xlu0 %571 }
 0x107   : > { %v580_v51 = vsel %vm576_vm0, %v574_v47, %v568_v41  ;;  %v577_v52 = vsel %vm576_vm0, %v572_v48, %v574_v47  ;;  %v578_v53 = vsel %vm576_vm0, %v570_v40, %v572_v48 }
 0x108   : > { %2077 = vst.msk [vmem:[%s2792_s19 + $0x4] ss:$8 sm:$0x3] %vm2767_vm4, %v534_v46  ;;  %v585_v54 = vsel %vm583_vm1, %v580_v51, %v579_v50  ;;  %v584_v55 = vsel %vm583_vm1, %v577_v52, %v580_v51  ;;  %v586_v56 = vsel %vm583_vm1, %v579_v50, %v578_v53  ;;  %v587_v57 = vsel %vm583_vm1, %v578_v53, %v577_v52 }
 0x109   : > { %1694 = vrot.lane.b32.xlu1 %v1676_v44, %s2930_s18  ;;  %v591_v58 = vsel %vm590_vm2, %v586_v56, %v584_v55  ;;  %v592_v60 = vsel %vm590_vm2, %v587_v57, %v585_v54  ;;  %1692 = vrot.lane.b32.xlu0 %v1672_v45, %s2930_s18  ;;  %v800_v53 = vstv %s2600_s23  ;;  %v1830_v54 = vrot.slane %v2112_v30, %v2445_v2  ;;  %v2114_v55 = vld [vmem:[%s2428_s16 + $0x47] ss:$8 sm:$0xf]  ;;  %s3035_s16 = sand.u32 127, %s1914_s4   ;;  %s881_s23 = sand.u32 1, %s3026_s13 }
 0x10a   : > { %v595_v0 = vcombine.low %v591_v58, %v592_v60  ;;  %v645_v6 = vpop.permute.xlu1 %644  ;;  %v643_v7 = vpop.permute.xlu0 %642  ;;  %v807_v60 = vstv %s806_s27  ;;  %vm801_vm10 = vcmp.lt.s32.totalorder %v2712_v25, %v800_v53  ;;  %v1901_v63 = vrot.slane %v2114_v55, %v2456_v5  ;;  %s3377_s27 = sld [smem:[#allocation21_spill]]  ;;  %s3379_s13 = sld [smem:[#allocation24_spill]] }
 0x10b   : > { %v654_v17 = vsel %vm651_vm3, %v643_v7, %v645_v6  ;;  %vm808_vm11 = vcmp.ne.s32.totalorder %v807_v60, 0  ;;  %v1909_v9 = vrot.slane %v2114_v55, %v2453_v4 }
 0x10c   : > { %v602_v10 = vrot.slane %v595_v0, %v2733_v35  ;;  %v1897_v0 = vrot.slane %v2114_v55, %v2448_v3 }
 0x10d   : > { %1698 = vrot.lane.b32.xlu1 %v1684_v49, %s2930_s18  ;;  %1696 = vrot.lane.b32.xlu0 %v1680_v62, %s2930_s18 }
 0x10e   : > { %v609_v13 = vrot.slane %v602_v10, %v2733_v35  ;;  %v649_v14 = vpop.permute.xlu1 %648  ;;  %v647_v15 = vpop.permute.xlu0 %646 }
 0x10f   : > { %v655_v18 = vsel %vm651_vm3, %v649_v14, %v643_v7  ;;  %v652_v19 = vsel %vm651_vm3, %v647_v15, %v649_v14  ;;  %v653_v20 = vsel %vm651_vm3, %v645_v6, %v647_v15 }
 0x110   : > { %2079 = vst.msk [vmem:[%s2792_s19 + $0x5] ss:$8 sm:$0x3] %vm2767_vm4, %v609_v13  ;;  %v660_v21 = vsel %vm658_vm5, %v655_v18, %v654_v17  ;;  %v659_v22 = vsel %vm658_vm5, %v652_v19, %v655_v18  ;;  %v661_v23 = vsel %vm658_vm5, %v654_v17, %v653_v20  ;;  %v662_v24 = vsel %vm658_vm5, %v653_v20, %v652_v19  ;;  %s3378_s15 = sand.u32 511, %s3377_s27  }
 0x111   : > { %1769 = vrot.lane.b32.xlu1 %v1751_v11, %s2966_s12  ;;  %v666_v26 = vsel %vm665_vm6, %v661_v23, %v659_v22  ;;  %v667_v27 = vsel %vm665_vm6, %v662_v24, %v660_v21  ;;  %1767 = vrot.lane.b32.xlu0 %v1747_v12, %s2966_s12  ;;  %v875_v17 = vstv %s3376_s20  ;;  %v1905_v18 = vrot.slane %v2114_v55, %v2445_v2  ;;  %s941_s3 = sshrl.u32 %s3378_s15, 7  ;;  %s3380_s20 = sld [smem:[#allocation23_spill]] }
 0x112   : > { %v670_v31 = vcombine.low %v666_v26, %v667_v27  ;;  %v720_v32 = vpop.permute.xlu1 %719  ;;  %v718_v33 = vpop.permute.xlu0 %717  ;;  %v882_v22 = vstv %s881_s23  ;;  %v889_v23 = vstv %s888_s28  ;;  %vm876_vm13 = vcmp.lt.s32.totalorder %v2712_v25, %v875_v17  ;;  %s956_s23 = sand.u32 1, %s941_s3  ;;  %s963_s28 = sand.u32 2, %s941_s3 }
 0x113   : > { %v729_v43 = vsel %vm726_vm7, %v718_v33, %v720_v32  ;;  %vm883_vm14 = vcmp.ne.s32.totalorder %v882_v22, 0  ;;  %vm890_vm15 = vcmp.ne.s32.totalorder %v889_v23, 0  ;;  %s3382_s3 = sld [smem:[#allocation26_spill]] }
 0x114   : > { %v677_v37 = vrot.slane %v670_v31, %v2733_v35 }
 0x115   : > { %1773 = vrot.lane.b32.xlu1 %v1759_v16, %s2966_s12  ;;  %1771 = vrot.lane.b32.xlu0 %v1755_v29, %s2966_s12 }
 0x116   : > { %v684_v40 = vrot.slane %v677_v37, %v2733_v35  ;;  %v724_v41 = vpop.permute.xlu1 %723  ;;  %v722_v42 = vpop.permute.xlu0 %721 }
 0x117   : > { %v730_v44 = vsel %vm726_vm7, %v724_v41, %v718_v33  ;;  %v727_v45 = vsel %vm726_vm7, %v722_v42, %v724_v41  ;;  %v728_v46 = vsel %vm726_vm7, %v720_v32, %v722_v42  ;;  %s3381_s27 = sand.u32 511, %s3380_s20  }
 0x118   : > { %2081 = vst.msk [vmem:[%s2792_s19 + $0x6] ss:$8 sm:$0x3] %vm2767_vm4, %v684_v40  ;;  %v735_v47 = vsel %vm733_vm8, %v730_v44, %v729_v43  ;;  %v734_v48 = vsel %vm733_vm8, %v727_v45, %v730_v44  ;;  %v736_v49 = vsel %vm733_vm8, %v729_v43, %v728_v46  ;;  %v737_v50 = vsel %vm733_vm8, %v728_v46, %v727_v45  ;;  %s1016_s15 = sshrl.u32 %s3381_s27, 7 }
 0x119   : > { %1844 = vrot.lane.b32.xlu1 %v1826_v38, %s3002_s10  ;;  %v741_v51 = vsel %vm740_vm9, %v736_v49, %v734_v48  ;;  %v742_v52 = vsel %vm740_vm9, %v737_v50, %v735_v47  ;;  %1842 = vrot.lane.b32.xlu0 %v1822_v39, %s3002_s10  ;;  %v950_v39 = vstv %s3379_s13  ;;  %v964_v43 = vstv %s963_s28  ;;  %s3383_s13 = sld [smem:[#allocation25_spill]]  ;;  %s1038_s28 = sand.u32 2, %s1016_s15 }
 0x11a   : > { %v745_v56 = vcombine.low %v741_v51, %v742_v52  ;;  %v795_v57 = vpop.permute.xlu1 %794  ;;  %v793_v58 = vpop.permute.xlu0 %792  ;;  %vm951_vm0 = vcmp.lt.s32.totalorder %v2712_v25, %v950_v39  ;;  %vm965_vm2 = vcmp.ne.s32.totalorder %v964_v43, 0 }
 0x11b   : > { %v804_v10 = vsel %vm801_vm10, %v793_v58, %v795_v57 }
 0x11c   : > { %v752_v62 = vrot.slane %v745_v56, %v2733_v35 }
 0x11d   : > { %1848 = vrot.lane.b32.xlu1 %v1834_v1, %s3002_s10  ;;  %1846 = vrot.lane.b32.xlu0 %v1830_v54, %s3002_s10  ;;  %v957_v1 = vstv %s956_s23  ;;  %s1031_s23 = sand.u32 1, %s1016_s15  ;;  %s3385_s15 = sld [smem:[#allocation28_spill]] }
 0x11e   : > { %v759_v6 = vrot.slane %v752_v62, %v2733_v35  ;;  %v799_v7 = vpop.permute.xlu1 %798  ;;  %v797_v8 = vpop.permute.xlu0 %796  ;;  %vm958_vm1 = vcmp.ne.s32.totalorder %v957_v1, 0 }
 0x11f   : > { %v805_v5 = vsel %vm801_vm10, %v799_v7, %v793_v58  ;;  %v802_v11 = vsel %vm801_vm10, %v797_v8, %v799_v7  ;;  %v803_v12 = vsel %vm801_vm10, %v795_v57, %v797_v8  ;;  %v1025_v58 = vstv %s3382_s3  ;;  %s3384_s20 = sand.u32 511, %s3383_s13   ;;  %s3386_s3 = sld [smem:[#allocation27_spill]] }
 0x120   : > { %2083 = vst.msk [vmem:[%s2792_s19 + $0x7] ss:$8 sm:$0x3] %vm2767_vm4, %v759_v6  ;;  %v810_v3 = vsel %vm808_vm11, %v805_v5, %v804_v10  ;;  %v809_v13 = vsel %vm808_vm11, %v802_v11, %v805_v5  ;;  %v811_v14 = vsel %vm808_vm11, %v804_v10, %v803_v12  ;;  %v812_v4 = vsel %vm808_vm11, %v803_v12, %v802_v11  ;;  %s1091_s27 = sshrl.u32 %s3384_s20, 7 }
 0x121   : > { %1919 = vrot.lane.b32.xlu1 %v1901_v63, %s3035_s16  ;;  %v816_v15 = vsel %vm815_vm12, %v811_v14, %v809_v13  ;;  %v817_v16 = vsel %vm815_vm12, %v812_v4, %v810_v3  ;;  %1917 = vrot.lane.b32.xlu0 %v1897_v0, %s3035_s16  ;;  %v1032_v63 = vstv %s1031_s23  ;;  %v1039_v0 = vstv %s1038_s28  ;;  %s1106_s23 = sand.u32 1, %s1091_s27  ;;  %s1113_s28 = sand.u32 2, %s1091_s27 }
 0x122   : > { %v820_v19 = vcombine.low %v816_v15, %v817_v16  ;;  %v870_v20 = vpop.permute.xlu1 %869  ;;  %v868_v21 = vpop.permute.xlu0 %867  ;;  %vm1026_vm3 = vcmp.lt.s32.totalorder %v2712_v25, %v1025_v58  ;;  %vm1033_vm5 = vcmp.ne.s32.totalorder %v1032_v63, 0  ;;  %vm1040_vm6 = vcmp.ne.s32.totalorder %v1039_v0, 0  ;;  %s3388_s27 = sld [smem:[#allocation29_spill]] }
 0x123   : > { %v879_v28 = vsel %vm876_vm13, %v868_v21, %v870_v20  ;;  %v1100_v17 = vstv %s3385_s15  ;;  %v1114_v22 = vstv %s1113_s28 }
 0x124   : > { %v827_v24 = vrot.slane %v820_v19, %v2733_v35  ;;  %vm1101_vm7 = vcmp.lt.s32.totalorder %v2712_v25, %v1100_v17  ;;  %vm1115_vm9 = vcmp.ne.s32.totalorder %v1114_v22, 0 }
 0x125   : > { %1923 = vrot.lane.b32.xlu1 %v1909_v9, %s3035_s16  ;;  %1921 = vrot.lane.b32.xlu0 %v1905_v18, %s3035_s16  ;;  %s3387_s13 = sand.u32 511, %s3386_s3  }
 0x126   : > { %v834_v26 = vrot.slane %v827_v24, %v2733_v35  ;;  %v874_v27 = vpop.permute.xlu1 %873  ;;  %v872_v2 = vpop.permute.xlu0 %871  ;;  %s1166_s20 = sshrl.u32 %s3387_s13, 7 }
 0x127   : > { %v880_v29 = vsel %vm876_vm13, %v874_v27, %v868_v21  ;;  %v877_v30 = vsel %vm876_vm13, %v872_v2, %v874_v27  ;;  %v878_v31 = vsel %vm876_vm13, %v870_v20, %v872_v2  ;;  %v1107_v21 = vstv %s1106_s23  ;;  %s1181_s15 = sand.u32 1, %s1166_s20  ;;  %s1188_s23 = sand.u32 2, %s1166_s20 }
 0x128   : > { %2085 = vst.msk [vmem:[%s2792_s19 + $0x10] ss:$8 sm:$0x3] %vm2767_vm4, %v834_v26  ;;  %v885_v32 = vsel %vm883_vm14, %v880_v29, %v879_v28  ;;  %v884_v33 = vsel %vm883_vm14, %v877_v30, %v880_v29  ;;  %v886_v34 = vsel %vm883_vm14, %v879_v28, %v878_v31  ;;  %v887_v36 = vsel %vm883_vm14, %v878_v31, %v877_v30  ;;  %s3389_s3 = sand.u32 511, %s3388_s27   ;;  %s3390_s20 = sand.u32 511, %s2694_s30  }
 0x129   : > { %v891_v37 = vsel %vm890_vm15, %v886_v34, %v884_v33  ;;  %v892_v38 = vsel %vm890_vm15, %v887_v36, %v885_v32  ;;  %vm1108_vm8 = vcmp.ne.s32.totalorder %v1107_v21, 0  ;;  %v1189_v1 = vstv %s1188_s23  ;;  %s1241_s28 = sshrl.u32 %s3389_s3, 7  ;;  %s3104_s27 = sshrl.u32 %s3390_s20, 7 }
 0x12a   : > { %v895_v40 = vcombine.low %v891_v37, %v892_v38  ;;  %v945_v41 = vpop.permute.xlu1 %944  ;;  %v943_v42 = vpop.permute.xlu0 %942  ;;  %v1175_v38 = vstv %s2685_s2  ;;  %vm1190_vm12 = vcmp.ne.s32.totalorder %v1189_v1, 0  ;;  %s1256_s2 = sand.u32 1, %s1241_s28  ;;  %s1263_s13 = sand.u32 2, %s1241_s28 }
 0x12b   : > { %v954_v48 = vsel %vm951_vm0, %v943_v42, %v945_v41  ;;  %vm1176_vm10 = vcmp.lt.s32.totalorder %v2712_v25, %v1175_v38  ;;  %v1264_v63 = vstv %s1263_s13  ;;  %s1331_s30 = sand.u32 1, %s3104_s27  ;;  %s3392_s3 = sand.u32 511, %s2752_s22  }
 0x12c   : > { %v902_v44 = vrot.slane %v895_v40, %v2733_v35  ;;  %vm1265_vm15 = vcmp.ne.s32.totalorder %v1264_v63, 0  ;;  %s3130_s28 = sshrl.u32 %s3392_s3, 7  ;;  %s3394_s20 = sand.u32 511, %s2845_s9  }
 0x12d   : > { %s1481_s22 = sand.u32 1, %s3130_s28 }
 0x12e   : > { %v909_v45 = vrot.slane %v902_v44, %v2733_v35  ;;  %v949_v46 = vpop.permute.xlu1 %948  ;;  %v947_v47 = vpop.permute.xlu0 %946 }
 0x12f   : > { %v955_v49 = vsel %vm951_vm0, %v949_v46, %v943_v42  ;;  %v952_v50 = vsel %vm951_vm0, %v947_v47, %v949_v46  ;;  %v953_v51 = vsel %vm951_vm0, %v945_v41, %v947_v47  ;;  %v1182_v42 = vstv %s1181_s15  ;;  %s3391_s15 = sand.u32 511, %s2717_s21  }
 0x130   : > { %2087 = vst.msk [vmem:[%s2792_s19 + $0x11] ss:$8 sm:$0x3] %vm2767_vm4, %v909_v45  ;;  %v960_v52 = vsel %vm958_vm1, %v955_v49, %v954_v48  ;;  %v959_v53 = vsel %vm958_vm1, %v952_v50, %v955_v49  ;;  %v961_v54 = vsel %vm958_vm1, %v954_v48, %v953_v51  ;;  %v962_v55 = vsel %vm958_vm1, %v953_v51, %v952_v50  ;;  %s3117_s23 = sshrl.u32 %s3391_s15, 7  ;;  %s3182_s15 = sshrl.u32 %s1764_s0, 7 }
 0x131   : > { %v966_v56 = vsel %vm965_vm2, %v961_v54, %v959_v53  ;;  %v967_v57 = vsel %vm965_vm2, %v962_v55, %v960_v52  ;;  %vm1183_vm11 = vcmp.ne.s32.totalorder %v1182_v42, 0  ;;  %s1413_s21 = sand.u32 2, %s3117_s23  ;;  %s1781_s24 = sand.u32 1, %s3182_s15 }
 0x132   : > { %v970_v60 = vcombine.low %v966_v56, %v967_v57  ;;  %v1020_v61 = vpop.permute.xlu1 %1019  ;;  %v1018_v62 = vpop.permute.xlu0 %1017  ;;  %v1250_v57 = vstv %s2704_s29  ;;  %s1338_s29 = sand.u32 2, %s3104_s27  ;;  %v1414_v42 = vstv %s1413_s21  ;;  %s3156_s27 = sshrl.u32 %s3394_s20, 7 }
 0x133   : > { %v1029_v10 = vsel %vm1026_vm3, %v1018_v62, %v1020_v61  ;;  %vm1251_vm13 = vcmp.lt.s32.totalorder %v2712_v25, %v1250_v57  ;;  %v1339_v22 = vstv %s1338_s29  ;;  %s1631_s9 = sand.u32 1, %s3156_s27  ;;  %s3195_s0 = sshrl.u32 %s1839_s7, 7 }
 0x134   : > { %v977_v6 = vrot.slane %v970_v60, %v2733_v35  ;;  %vm1340_vm2 = vcmp.ne.s32.totalorder %v1339_v22, 0  ;;  %s1856_s5 = sand.u32 1, %s3195_s0  ;;  %s1916_s7 = sshrl.u32 %s1914_s4, 7 }
 0x135   : > { %s1938_s11 = sand.u32 2, %s1916_s7  ;;  %s3396_s4 = sld [smem:[#allocation20_spill]] }
 0x136   : > { %v984_v7 = vrot.slane %v977_v6, %v2733_v35  ;;  %v1024_v8 = vpop.permute.xlu1 %1023  ;;  %v1022_v9 = vpop.permute.xlu0 %1021 }
 0x137   : > { %v1030_v5 = vsel %vm1026_vm3, %v1024_v8, %v1018_v62  ;;  %v1027_v11 = vsel %vm1026_vm3, %v1022_v9, %v1024_v8  ;;  %v1028_v12 = vsel %vm1026_vm3, %v1020_v61, %v1022_v9  ;;  %v1257_v62 = vstv %s1256_s2  ;;  %s3393_s2 = sand.u32 511, %s2809_s1  }
 0x138   : > { %2089 = vst.msk [vmem:[%s2792_s19 + $0x12] ss:$8 sm:$0x3] %vm2767_vm4, %v984_v7  ;;  %v1035_v3 = vsel %vm1033_vm5, %v1030_v5, %v1029_v10  ;;  %v1034_v13 = vsel %vm1033_vm5, %v1027_v11, %v1030_v5  ;;  %v1036_v14 = vsel %vm1033_vm5, %v1029_v10, %v1028_v12  ;;  %v1037_v4 = vsel %vm1033_vm5, %v1028_v12, %v1027_v11  ;;  %s3143_s13 = sshrl.u32 %s3393_s2, 7 }
 0x139   : > { %v1041_v15 = vsel %vm1040_vm6, %v1036_v14, %v1034_v13  ;;  %v1042_v16 = vsel %vm1040_vm6, %v1037_v4, %v1035_v3  ;;  %vm1258_vm14 = vcmp.ne.s32.totalorder %v1257_v62, 0  ;;  %vm1415_vm6 = vcmp.ne.s32.totalorder %v1414_v42, 0  ;;  %s1556_s1 = sand.u32 1, %s3143_s13 }
 0x13a   : > { %v1045_v18 = vcombine.low %v1041_v15, %v1042_v16  ;;  %v1095_v19 = vpop.permute.xlu1 %1094  ;;  %v1093_v20 = vpop.permute.xlu0 %1092  ;;  %v1325_v16 = vstv %s2729_s17  ;;  %s1406_s17 = sand.u32 1, %s3117_s23 }
 0x13b   : > { %v1104_v2 = vsel %vm1101_vm7, %v1093_v20, %v1095_v19  ;;  %vm1326_vm0 = vcmp.lt.s32.totalorder %v2712_v25, %v1325_v16 }
 0x13c   : > { %v1052_v23 = vrot.slane %v1045_v18, %v2733_v35 }
 0x13e   : > { %v1059_v24 = vrot.slane %v1052_v23, %v2733_v35  ;;  %v1099_v26 = vpop.permute.xlu1 %1098  ;;  %v1097_v27 = vpop.permute.xlu0 %1096 }
 0x13f   : > { %v1105_v28 = vsel %vm1101_vm7, %v1099_v26, %v1093_v20  ;;  %v1102_v29 = vsel %vm1101_vm7, %v1097_v27, %v1099_v26  ;;  %v1103_v30 = vsel %vm1101_vm7, %v1095_v19, %v1097_v27  ;;  %v1332_v19 = vstv %s1331_s30  ;;  %s3395_s30 = sand.u32 511, %s2881_s26  }
 0x140   : > { %2091 = vst.msk [vmem:[%s2792_s19 + $0x13] ss:$8 sm:$0x3] %vm2767_vm4, %v1059_v24  ;;  %v1110_v31 = vsel %vm1108_vm8, %v1105_v28, %v1104_v2  ;;  %v1109_v32 = vsel %vm1108_vm8, %v1102_v29, %v1105_v28  ;;  %v1111_v33 = vsel %vm1108_vm8, %v1104_v2, %v1103_v30  ;;  %v1112_v34 = vsel %vm1108_vm8, %v1103_v30, %v1102_v29  ;;  %s3169_s29 = sshrl.u32 %s3395_s30, 7 }
 0x141   : > { %v1116_v36 = vsel %vm1115_vm9, %v1111_v33, %v1109_v32  ;;  %v1117_v37 = vsel %vm1115_vm9, %v1112_v34, %v1110_v31  ;;  %vm1333_vm1 = vcmp.ne.s32.totalorder %v1332_v19, 0  ;;  %v1400_v34 = vstv %s2774_s25  ;;  %s1488_s25 = sand.u32 2, %s3130_s28  ;;  %s1706_s26 = sand.u32 1, %s3169_s29 }
 0x142   : > { %v1120_v39 = vcombine.low %v1116_v36, %v1117_v37  ;;  %v1170_v40 = vpop.permute.xlu1 %1169  ;;  %v1168_v41 = vpop.permute.xlu0 %1167  ;;  %vm1401_vm3 = vcmp.lt.s32.totalorder %v2712_v25, %v1400_v34  ;;  %v1489_v62 = vstv %s1488_s25 }
 0x143   : > { %v1179_v47 = vsel %vm1176_vm10, %v1168_v41, %v1170_v40  ;;  %vm1490_vm9 = vcmp.ne.s32.totalorder %v1489_v62, 0 }
 0x144   : > { %v1127_v43 = vrot.slane %v1120_v39, %v2733_v35  ;;  %v1407_v39 = vstv %s1406_s17  ;;  %s3398_s17 = sld [smem:[#allocation15_spill]] (%p2368_p12) }
 0x145   : > { %vm1408_vm5 = vcmp.ne.s32.totalorder %v1407_v39, 0 }
 0x146   : > { %v1134_v44 = vrot.slane %v1127_v43, %v2733_v35  ;;  %v1174_v45 = vpop.permute.xlu1 %1173  ;;  %v1172_v46 = vpop.permute.xlu0 %1171 }
 0x147   : > { %v1180_v48 = vsel %vm1176_vm10, %v1174_v45, %v1168_v41  ;;  %v1177_v49 = vsel %vm1176_vm10, %v1172_v46, %v1174_v45  ;;  %v1178_v50 = vsel %vm1176_vm10, %v1170_v40, %v1172_v46 }
 0x148   : > { %2093 = vst.msk [vmem:[%s2792_s19 + $0x14] ss:$8 sm:$0x3] %vm2767_vm4, %v1134_v44  ;;  %v1185_v51 = vsel %vm1183_vm11, %v1180_v48, %v1179_v47  ;;  %v1184_v52 = vsel %vm1183_vm11, %v1177_v49, %v1180_v48  ;;  %v1186_v53 = vsel %vm1183_vm11, %v1179_v47, %v1178_v50  ;;  %v1187_v54 = vsel %vm1183_vm11, %v1178_v50, %v1177_v49 }
 0x149   : > { %v1191_v55 = vsel %vm1190_vm12, %v1186_v53, %v1184_v52  ;;  %v1192_v56 = vsel %vm1190_vm12, %v1187_v54, %v1185_v51  ;;  %v1475_v54 = vstv %s2822_s6  ;;  %s1563_s6 = sand.u32 2, %s3143_s13 }
 0x14a   : > { %v1195_v58 = vcombine.low %v1191_v55, %v1192_v56  ;;  %v1245_v60 = vpop.permute.xlu1 %1244  ;;  %v1243_v61 = vpop.permute.xlu0 %1242  ;;  %vm1476_vm7 = vcmp.lt.s32.totalorder %v2712_v25, %v1475_v54  ;;  %s1972_s3 = smul.u32 (%p2368_p12), 3, %s3398_s17 }
 0x14b   : > { %v1254_v9 = vsel %vm1251_vm13, %v1243_v61, %v1245_v60 }
 0x14c   : > { %v1202_v0 = vrot.slane %v1195_v58, %v2733_v35  ;;  %v1482_v58 = vstv %s1481_s22  ;;  %s1973_s28 = ssub.s32 (%p2368_p12), 5, %s1972_s3 }
 0x14d   : > { %vm1483_vm8 = vcmp.ne.s32.totalorder %v1482_v58, 0  ;;  %p1974_p9 = scmp.lt.s32.totalorder (%p2368_p12), %s1973_s28, 3 }
 0x14e   : > { %v1209_v6 = vrot.slane %v1202_v0, %v2733_v35  ;;  %v1249_v7 = vpop.permute.xlu1 %1248  ;;  %v1247_v8 = vpop.permute.xlu0 %1246 }
 0x14f   : > { %v1255_v10 = vsel %vm1251_vm13, %v1249_v7, %v1243_v61  ;;  %v1252_v5 = vsel %vm1251_vm13, %v1247_v8, %v1249_v7  ;;  %v1253_v11 = vsel %vm1251_vm13, %v1245_v60, %v1247_v8 }
 0x150   : > { %2095 = vst.msk [vmem:[%s2792_s19 + $0x15] ss:$8 sm:$0x3] %vm2767_vm4, %v1209_v6  ;;  %v1260_v12 = vsel %vm1258_vm14, %v1255_v10, %v1254_v9  ;;  %v1259_v3 = vsel %vm1258_vm14, %v1252_v5, %v1255_v10  ;;  %v1261_v13 = vsel %vm1258_vm14, %v1254_v9, %v1253_v11  ;;  %v1262_v14 = vsel %vm1258_vm14, %v1253_v11, %v1252_v5 }
 0x151   : > { %v1266_v4 = vsel %vm1265_vm15, %v1261_v13, %v1259_v3  ;;  %v1267_v15 = vsel %vm1265_vm15, %v1262_v14, %v1260_v12  ;;  %v1550_v14 = vstv %s2858_s14  ;;  %s1638_s14 = sand.u32 2, %s3156_s27 }
 0x152   : > { %v1270_v17 = vcombine.low %v1266_v4, %v1267_v15  ;;  %v1320_v18 = vpop.permute.xlu1 %1319  ;;  %vm1551_vm10 = vcmp.lt.s32.totalorder %v2712_v25, %v1550_v14 }
 0x153   : > { %v1318_v20 = vpop.permute.xlu0 %1317 }
 0x154   : > { %v1277_v21 = vrot.slane %v1270_v17, %v2733_v35  ;;  %v1329_v26 = vsel %vm1326_vm0, %v1318_v20, %v1320_v18  ;;  %v1557_v17 = vstv %s1556_s1 }
 0x155   : > { %vm1558_vm11 = vcmp.ne.s32.totalorder %v1557_v17, 0 }
 0x156   : > { %v1284_v23 = vrot.slane %v1277_v21, %v2733_v35  ;;  %v1324_v24 = vpop.permute.xlu1 %1323 }
 0x157   : > { %v1330_v27 = vsel %vm1326_vm0, %v1324_v24, %v1318_v20  ;;  %v1322_v2 = vpop.permute.xlu0 %1321  ;;  %v1564_v20 = vstv %s1563_s6 }
 0x158   : > { %2097 = vst.msk [vmem:[%s2792_s19 + $0x16] ss:$8 sm:$0x3] %vm2767_vm4, %v1284_v23  ;;  %v1335_v28 = vsel %vm1333_vm1, %v1330_v27, %v1329_v26  ;;  %v1327_v29 = vsel %vm1326_vm0, %v1322_v2, %v1324_v24  ;;  %v1328_v30 = vsel %vm1326_vm0, %v1320_v18, %v1322_v2  ;;  %vm1565_vm12 = vcmp.ne.s32.totalorder %v1564_v20, 0 }
 0x159   : > { %v1334_v31 = vsel %vm1333_vm1, %v1327_v29, %v1330_v27  ;;  %v1336_v32 = vsel %vm1333_vm1, %v1329_v26, %v1328_v30  ;;  %v1337_v33 = vsel %vm1333_vm1, %v1328_v30, %v1327_v29 }
 0x15a   : > { %v1341_v36 = vsel %vm1340_vm2, %v1336_v32, %v1334_v31  ;;  %v1342_v37 = vsel %vm1340_vm2, %v1337_v33, %v1335_v28  ;;  %v1625_v33 = vstv %s2894_s8  ;;  %s1713_s8 = sand.u32 2, %s3169_s29 }
 0x15b   : > { %v1395_v38 = vpop.permute.xlu1 %1394  ;;  %v1345_v40 = vcombine.low %v1341_v36, %v1342_v37  ;;  %v1393_v41 = vpop.permute.xlu0 %1392  ;;  %vm1626_vm13 = vcmp.lt.s32.totalorder %v2712_v25, %v1625_v33 }
 0x15c   : > { %v1404_v45 = vsel %vm1401_vm3, %v1393_v41, %v1395_v38 }
 0x15d   : > { %v1352_v1 = vrot.slane %v1345_v40, %v2733_v35 }
 0x15f   : > { %v1399_v43 = vpop.permute.xlu1 %1398  ;;  %v1359_v44 = vrot.slane %v1352_v1, %v2733_v35  ;;  %v1397_v47 = vpop.permute.xlu0 %1396 }
 0x160   : > { %v1405_v46 = vsel %vm1401_vm3, %v1399_v43, %v1393_v41  ;;  %v1402_v49 = vsel %vm1401_vm3, %v1397_v47, %v1399_v43  ;;  %v1403_v50 = vsel %vm1401_vm3, %v1395_v38, %v1397_v47  ;;  %v1632_v38 = vstv %s1631_s9 }
 0x161   : > { %v1410_v48 = vsel %vm1408_vm5, %v1405_v46, %v1404_v45  ;;  %2099 = vst.msk [vmem:[%s2792_s19 + $0x17] ss:$8 sm:$0x3] %vm2767_vm4, %v1359_v44  ;;  %v1409_v51 = vsel %vm1408_vm5, %v1402_v49, %v1405_v46  ;;  %v1411_v52 = vsel %vm1408_vm5, %v1404_v45, %v1403_v50  ;;  %v1412_v53 = vsel %vm1408_vm5, %v1403_v50, %v1402_v49 }
 0x162   : > { %v1416_v55 = vsel %vm1415_vm6, %v1411_v52, %v1409_v51  ;;  %v1417_v56 = vsel %vm1415_vm6, %v1412_v53, %v1410_v48  ;;  %v1639_v41 = vstv %s1638_s14  ;;  %vm1633_vm14 = vcmp.ne.s32.totalorder %v1632_v38, 0 }
 0x163   : > { %v1470_v57 = vpop.permute.xlu1 %1469  ;;  %v1420_v60 = vcombine.low %v1416_v55, %v1417_v56  ;;  %v1468_v61 = vpop.permute.xlu0 %1467  ;;  %vm1640_vm15 = vcmp.ne.s32.totalorder %v1639_v41, 0  ;;  %v1700_v53 = vstv %s2930_s18  ;;  %s1788_s18 = sand.u32 2, %s3182_s15 }
 0x164   : > { %v1479_v7 = vsel %vm1476_vm7, %v1468_v61, %v1470_v57  ;;  %vm1701_vm0 = vcmp.lt.s32.totalorder %v2712_v25, %v1700_v53 }
 0x165   : > { %v1427_v63 = vrot.slane %v1420_v60, %v2733_v35 }
 0x167   : > { %v1474_v0 = vpop.permute.xlu1 %1473  ;;  %v1434_v6 = vrot.slane %v1427_v63, %v2733_v35  ;;  %v1472_v9 = vpop.permute.xlu0 %1471 }
 0x168   : > { %v1480_v8 = vsel %vm1476_vm7, %v1474_v0, %v1468_v61  ;;  %v1477_v5 = vsel %vm1476_vm7, %v1472_v9, %v1474_v0  ;;  %v1478_v11 = vsel %vm1476_vm7, %v1470_v57, %v1472_v9  ;;  %v1707_v57 = vstv %s1706_s26 }
 0x169   : > { %v1485_v10 = vsel %vm1483_vm8, %v1480_v8, %v1479_v7  ;;  %2101 = vst.msk [vmem:[%s2792_s19 + $0x20] ss:$8 sm:$0x3] %vm2767_vm4, %v1434_v6  ;;  %v1484_v12 = vsel %vm1483_vm8, %v1477_v5, %v1480_v8  ;;  %v1486_v3 = vsel %vm1483_vm8, %v1479_v7, %v1478_v11  ;;  %v1487_v13 = vsel %vm1483_vm8, %v1478_v11, %v1477_v5 }
 0x16a   : > { %v1491_v4 = vsel %vm1490_vm9, %v1486_v3, %v1484_v12  ;;  %v1492_v15 = vsel %vm1490_vm9, %v1487_v13, %v1485_v10  ;;  %v1714_v61 = vstv %s1713_s8  ;;  %vm1708_vm1 = vcmp.ne.s32.totalorder %v1707_v57, 0 }
 0x16b   : > { %v1545_v16 = vpop.permute.xlu1 %1544  ;;  %v1495_v18 = vcombine.low %v1491_v4, %v1492_v15  ;;  %v1543_v19 = vpop.permute.xlu0 %1542  ;;  %vm1715_vm2 = vcmp.ne.s32.totalorder %v1714_v61, 0  ;;  %v1775_v13 = vstv %s2966_s12  ;;  %s1863_s12 = sand.u32 2, %s3195_s0 }
 0x16c   : > { %v1554_v24 = vsel %vm1551_vm10, %v1543_v19, %v1545_v16  ;;  %vm1776_vm3 = vcmp.lt.s32.totalorder %v2712_v25, %v1775_v13 }
 0x16d   : > { %v1502_v21 = vrot.slane %v1495_v18, %v2733_v35 }
 0x16f   : > { %v1549_v22 = vpop.permute.xlu1 %1548  ;;  %v1509_v23 = vrot.slane %v1502_v21, %v2733_v35  ;;  %v1547_v27 = vpop.permute.xlu0 %1546 }
 0x170   : > { %v1555_v26 = vsel %vm1551_vm10, %v1549_v22, %v1543_v19  ;;  %v1552_v28 = vsel %vm1551_vm10, %v1547_v27, %v1549_v22  ;;  %v1553_v29 = vsel %vm1551_vm10, %v1545_v16, %v1547_v27  ;;  %v1782_v16 = vstv %s1781_s24 }
 0x171   : > { %v1560_v2 = vsel %vm1558_vm11, %v1555_v26, %v1554_v24  ;;  %2103 = vst.msk [vmem:[%s2792_s19 + $0x21] ss:$8 sm:$0x3] %vm2767_vm4, %v1509_v23  ;;  %v1559_v30 = vsel %vm1558_vm11, %v1552_v28, %v1555_v26  ;;  %v1561_v31 = vsel %vm1558_vm11, %v1554_v24, %v1553_v29  ;;  %v1562_v32 = vsel %vm1558_vm11, %v1553_v29, %v1552_v28 }
 0x172   : > { %v1566_v34 = vsel %vm1565_vm12, %v1561_v31, %v1559_v30  ;;  %v1567_v36 = vsel %vm1565_vm12, %v1562_v32, %v1560_v2  ;;  %v1789_v19 = vstv %s1788_s18  ;;  %vm1783_vm5 = vcmp.ne.s32.totalorder %v1782_v16, 0 }
 0x173   : > { %v1620_v37 = vpop.permute.xlu1 %1619  ;;  %v1570_v39 = vcombine.low %v1566_v34, %v1567_v36  ;;  %v1618_v40 = vpop.permute.xlu0 %1617  ;;  %vm1790_vm6 = vcmp.ne.s32.totalorder %v1789_v19, 0  ;;  %v1850_v32 = vstv %s3002_s10  ;;  %s1931_s10 = sand.u32 1, %s1916_s7 }
 0x174   : > { %v1629_v44 = vsel %vm1626_vm13, %v1618_v40, %v1620_v37  ;;  %vm1851_vm7 = vcmp.lt.s32.totalorder %v2712_v25, %v1850_v32 }
 0x175   : > { %v1577_v42 = vrot.slane %v1570_v39, %v2733_v35 }
 0x177   : > { %v1624_v1 = vpop.permute.xlu1 %1623  ;;  %v1584_v43 = vrot.slane %v1577_v42, %v2733_v35  ;;  %v1622_v46 = vpop.permute.xlu0 %1621 }
 0x178   : > { %v1630_v45 = vsel %vm1626_vm13, %v1624_v1, %v1618_v40  ;;  %v1627_v48 = vsel %vm1626_vm13, %v1622_v46, %v1624_v1  ;;  %v1628_v49 = vsel %vm1626_vm13, %v1620_v37, %v1622_v46  ;;  %v1857_v37 = vstv %s1856_s5 }
 0x179   : > { %v1635_v47 = vsel %vm1633_vm14, %v1630_v45, %v1629_v44  ;;  %2105 = vst.msk [vmem:[%s2792_s19 + $0x22] ss:$8 sm:$0x3] %vm2767_vm4, %v1584_v43  ;;  %v1634_v50 = vsel %vm1633_vm14, %v1627_v48, %v1630_v45  ;;  %v1636_v51 = vsel %vm1633_vm14, %v1629_v44, %v1628_v49  ;;  %v1637_v52 = vsel %vm1633_vm14, %v1628_v49, %v1627_v48 }
 0x17a   : > { %v1641_v54 = vsel %vm1640_vm15, %v1636_v51, %v1634_v50  ;;  %v1642_v55 = vsel %vm1640_vm15, %v1637_v52, %v1635_v47  ;;  %v1864_v40 = vstv %s1863_s12  ;;  %vm1858_vm8 = vcmp.ne.s32.totalorder %v1857_v37, 0 }
 0x17b   : > { %v1695_v56 = vpop.permute.xlu1 %1694  ;;  %v1645_v58 = vcombine.low %v1641_v54, %v1642_v55  ;;  %v1693_v60 = vpop.permute.xlu0 %1692  ;;  %vm1865_vm9 = vcmp.ne.s32.totalorder %v1864_v40, 0  ;;  %v1925_v52 = vstv %s3035_s16  ;;  %s1965_s16 = scalar_lea.sflag [#allocation6], %s3396_s4 }
 0x17c   : > { %v1704_v6 = vsel %vm1701_vm0, %v1693_v60, %v1695_v56  ;;  %vm1926_vm10 = vcmp.lt.s32.totalorder %v2712_v25, %v1925_v52 }
 0x17d   : > { %v1652_v62 = vrot.slane %v1645_v58, %v2733_v35 }
 0x17f   : > { %v1699_v63 = vpop.permute.xlu1 %1698  ;;  %v1659_v0 = vrot.slane %v1652_v62, %v2733_v35  ;;  %v1697_v8 = vpop.permute.xlu0 %1696 }
 0x180   : > { %v1705_v7 = vsel %vm1701_vm0, %v1699_v63, %v1693_v60  ;;  %v1702_v10 = vsel %vm1701_vm0, %v1697_v8, %v1699_v63  ;;  %v1703_v5 = vsel %vm1701_vm0, %v1695_v56, %v1697_v8  ;;  %v1932_v56 = vstv %s1931_s10 }
 0x181   : > { %v1710_v9 = vsel %vm1708_vm1, %v1705_v7, %v1704_v6  ;;  %2107 = vst.msk [vmem:[%s2792_s19 + $0x23] ss:$8 sm:$0x3] %vm2767_vm4, %v1659_v0  ;;  %v1709_v11 = vsel %vm1708_vm1, %v1702_v10, %v1705_v7  ;;  %v1711_v12 = vsel %vm1708_vm1, %v1704_v6, %v1703_v5  ;;  %v1712_v3 = vsel %vm1708_vm1, %v1703_v5, %v1702_v10 }
 0x182   : > { %v1716_v14 = vsel %vm1715_vm2, %v1711_v12, %v1709_v11  ;;  %v1717_v4 = vsel %vm1715_vm2, %v1712_v3, %v1710_v9  ;;  %v1939_v60 = vstv %s1938_s11  ;;  %vm1933_vm11 = vcmp.ne.s32.totalorder %v1932_v56, 0 }
 0x183   : > { %v1770_v15 = vpop.permute.xlu1 %1769  ;;  %v1720_v17 = vcombine.low %v1716_v14, %v1717_v4  ;;  %v1768_v18 = vpop.permute.xlu0 %1767  ;;  %vm1940_vm12 = vcmp.ne.s32.totalorder %v1939_v60, 0 }
 0x184   : > { %v1779_v23 = vsel %vm1776_vm3, %v1768_v18, %v1770_v15 }
 0x185   : > { %v1727_v20 = vrot.slane %v1720_v17, %v2733_v35 }
 0x187   : > { %v1774_v21 = vpop.permute.xlu1 %1773  ;;  %v1734_v22 = vrot.slane %v1727_v20, %v2733_v35  ;;  %v1772_v26 = vpop.permute.xlu0 %1771 }
 0x188   : > { %v1780_v24 = vsel %vm1776_vm3, %v1774_v21, %v1768_v18  ;;  %v1777_v2 = vsel %vm1776_vm3, %v1772_v26, %v1774_v21  ;;  %v1778_v28 = vsel %vm1776_vm3, %v1770_v15, %v1772_v26 }
 0x189   : > { %v1785_v27 = vsel %vm1783_vm5, %v1780_v24, %v1779_v23  ;;  %2109 = vst.msk [vmem:[%s2792_s19 + $0x24] ss:$8 sm:$0x3] %vm2767_vm4, %v1734_v22  ;;  %v1784_v29 = vsel %vm1783_vm5, %v1777_v2, %v1780_v24  ;;  %v1786_v30 = vsel %vm1783_vm5, %v1779_v23, %v1778_v28  ;;  %v1787_v31 = vsel %vm1783_vm5, %v1778_v28, %v1777_v2 }
 0x18a   : > { %v1791_v33 = vsel %vm1790_vm6, %v1786_v30, %v1784_v29  ;;  %v1792_v34 = vsel %vm1790_vm6, %v1787_v31, %v1785_v27 }
 0x18b   : > { %v1845_v36 = vpop.permute.xlu1 %1844  ;;  %v1795_v38 = vcombine.low %v1791_v33, %v1792_v34  ;;  %v1843_v39 = vpop.permute.xlu0 %1842 }
 0x18c   : > { %v1854_v43 = vsel %vm1851_vm7, %v1843_v39, %v1845_v36 }
 0x18d   : > { %v1802_v41 = vrot.slane %v1795_v38, %v2733_v35 }
 0x18f   : > { %v1849_v42 = vpop.permute.xlu1 %1848  ;;  %v1809_v1 = vrot.slane %v1802_v41, %v2733_v35  ;;  %v1847_v45 = vpop.permute.xlu0 %1846 }
 0x190   : > { %v1855_v44 = vsel %vm1851_vm7, %v1849_v42, %v1843_v39  ;;  %v1852_v47 = vsel %vm1851_vm7, %v1847_v45, %v1849_v42  ;;  %v1853_v48 = vsel %vm1851_vm7, %v1845_v36, %v1847_v45 }
 0x191   : > { %v1860_v46 = vsel %vm1858_vm8, %v1855_v44, %v1854_v43  ;;  %2111 = vst.msk [vmem:[%s2792_s19 + $0x25] ss:$8 sm:$0x3] %vm2767_vm4, %v1809_v1  ;;  %v1859_v49 = vsel %vm1858_vm8, %v1852_v47, %v1855_v44  ;;  %v1861_v50 = vsel %vm1858_vm8, %v1854_v43, %v1853_v48  ;;  %v1862_v51 = vsel %vm1858_vm8, %v1853_v48, %v1852_v47 }
 0x192   : > { %v1866_v53 = vsel %vm1865_vm9, %v1861_v50, %v1859_v49  ;;  %v1867_v54 = vsel %vm1865_vm9, %v1862_v51, %v1860_v46 }
 0x193   : > { %v1920_v55 = vpop.permute.xlu1 %1919  ;;  %v1870_v57 = vcombine.low %v1866_v53, %v1867_v54  ;;  %v1918_v58 = vpop.permute.xlu0 %1917 }
 0x194   : > { %v1929_v0 = vsel %vm1926_vm10, %v1918_v58, %v1920_v55 }
 0x195   : > { %v1877_v61 = vrot.slane %v1870_v57, %v2733_v35 }
 0x197   : > { %v1924_v62 = vpop.permute.xlu1 %1923  ;;  %v1884_v63 = vrot.slane %v1877_v61, %v2733_v35  ;;  %v1922_v7 = vpop.permute.xlu0 %1921 }
 0x198   : > { %v1930_v6 = vsel %vm1926_vm10, %v1924_v62, %v1918_v58  ;;  %v1927_v9 = vsel %vm1926_vm10, %v1922_v7, %v1924_v62  ;;  %v1928_v10 = vsel %vm1926_vm10, %v1920_v55, %v1922_v7 }
 0x199   : > { %v1935_v8 = vsel %vm1933_vm11, %v1930_v6, %v1929_v0  ;;  %2113 = vst.msk [vmem:[%s2792_s19 + $0x26] ss:$8 sm:$0x3] %vm2767_vm4, %v1884_v63  ;;  %v1934_v25 = vsel %vm1933_vm11, %v1927_v9, %v1930_v6  ;;  %v1936_v5 = vsel %vm1933_vm11, %v1929_v0, %v1928_v10  ;;  %v1937_v11 = vsel %vm1933_vm11, %v1928_v10, %v1927_v9 }
 0x19a   : > { %v1941_v12 = vsel %vm1940_vm12, %v1936_v5, %v1934_v25  ;;  %v1942_v3 = vsel %vm1940_vm12, %v1937_v11, %v1935_v8 }
 0x19b   : > { %v1945_v13 = vcombine.low %v1941_v12, %v1942_v3  ;;  %1971 = sbr.rel (!%p2368_p12) target bundleno = 447 (0x1bf), region = 32 }
 0x19d   : > { %v1952_v14 = vrot.slane %v1945_v13, %v2733_v35 }
 0x19f   : > { %v1959_v4 = vrot.slane %v1952_v14, %v2733_v35 }
 0x1a1   : > { %2115 = vst.msk [vmem:[%s2792_s19 + $0x27] ss:$8 sm:$0x3] %vm2767_vm4, %v1959_v4 }
 0x1a2   : > { %s3414_s28 = smov (!%p1974_p9, %s1973_s28), 3 }
 0x1a3   : > { %s3230_s22 = sshll.u32 %s3414_s28, 8 }
 0x1a4   : > { %s1979_s25 = ssub.s32 768, %s3230_s22 }
 0x1a5   : > { %1980 = vsyncadd %s1965_s16, %s1979_s25  ;;  %p2118_p13 = scmp.ne.s32.totalorder %s3230_s22, 0  ;;  %s2132_s2 = smul.u32 768, %s3398_s17 }
 0x1a6   : > { %s1986_s13 = sshll.u32 %s2792_s19, 4  ;;  %s3400_s20 = sld [smem:[#allocation31_spill]]  ;;  %s3243_s13 = int_to_ptr.vmem [resolvable:$true] %s1986_s13 }
 0x1a7   : > { %s2219_s14 = scalar_lea.vmem %s3243_s13, %s3230_s22  ;;  %s2294_s30 = smov [#allocation7]  }
 0x1a8   : > { %p2220_p12 = scmp.ne.s32.totalorder %s3243_s13, %s2219_s14  ;;  %s2223_s29 = sshll.u32 %s2294_s30, 4  ;;  %s2224_s29 = int_to_ptr.vmem [resolvable:$false] %s2223_s29 }
 0x1a9   : > { %s2225_s26 = scalar_lea.vmem %s2224_s29, 1536  ;;  %p2226_p1 = scmp.lt.s32.totalorder %s3243_s13, %s2224_s29 }
 0x1aa   : > { %p2221_p0 = pnand %p2220_p12, %p2118_p13  ;;  %p2227_p3 = scmp.lt.s32.totalorder %s2225_s26, %s2219_s14 }
 0x1ac   : > { %s3401_s27 = smov %s3400_s20  ;;  %s3241_s9 = scalar_lea.hbm %s3400_s20, %s2132_s2 }
 0x1ad   : > { %p2222_p2 = pneg %p2221_p0  ;;  %p2228_p4 = por %p2227_p3, %p2226_p1 }
 0x1af   : > { %p2229_p6 = pnand %p2228_p4, %p2222_p2 }
 0x1b1   : > { %2232 = shalt.err (!%p2229_p6)
}
 0x1b2   : > { %s2233_s19 = scalar_lea.hbm %s3241_s9, %s3230_s22  ;;  %s2237_s24 = scalar_lea.hbm %s3401_s27, 1280 }
 0x1b3   : > { %p2234_p7 = scmp.ne.s32.totalorder %s3241_s9, %s2233_s19  ;;  %p2238_p10 = scmp.lt.u32.totalorder %s3241_s9, %s3401_s27 }
 0x1b4   : > { %p2239_p11 = scmp.lt.u32.totalorder %s2237_s24, %s2233_s19  ;;  %p2241_p12 = scmp.lt.u32.totalorder %s2233_s19, %s3241_s9 }
 0x1b5   : > { %p2235_p8 = pnand %p2234_p7, %p2118_p13 }
 0x1b6   : > { %p2240_p9 = por %p2239_p11, %p2238_p10 }
 0x1b7   : > { %p2236_p5 = pneg %p2235_p8 }
 0x1b8   : > { %p2242_p0 = por %p2241_p12, %p2240_p9 }
 0x1ba   : > { %p2243_p2 = pnand %p2242_p0, %p2236_p5 }
 0x1bc   : > { %2246 = shalt.err (!%p2243_p2)
}
 0x1bd   : > { %s2295_s5 = smov 256   ;;  %s2296_s12 = smov 16  }
 0x1be   : > { %1992 = dma.vmem_to_hbm [thread:$0]  (%p2118_p13), %s3243_s13, %s3230_s22, %s3241_s9, %s1965_s16, %s2295_s5, %s2295_s5, %s2296_s12  }
 0x1bf PF: > { %s3402_s7 = sld [smem:[#allocation11_spill]]  ;;  %s3403_s10 = sld [smem:[#allocation19_spill]] }
 0x1c0   : > { %s3404_s11 = sld [smem:[#allocation14_spill]] }
 0x1c5   : > { %s2001_s4 = sand.u32 1, %s3402_s7   ;;  %p3405_p1 = scmp.ne.s32.totalorder %s3403_s10, 0 }
 0x1c6   : > { %p3406_p3 = scmp.ge.s32.totalorder %s3404_s11, 2  ;;  %s2002_s23 = scalar_lea.sflag [#allocation6], %s2001_s4 }
 0x1c8   : > { %p2139_p4 = pnand %p3406_p3, %p3405_p1 }
 0x1ca   : > { %2270 = dma.done.wait (!%p2139_p4), %s2002_s23, 768  }
 0x1cb   : > { %2272 = vsyncadd (!%p2139_p4), %s2002_s23, 4294966528  ;;  %s3407_s22 = sld [smem:[#allocation16_spill]]  ;;  %s3408_s19 = sld [smem:[#allocation12_spill]] }
 0x1cc   : > { %s3409_s20 = sld [smem:[#allocation13_spill]]  ;;  %s3410_s21 = sld [smem:[#allocation17_spill]] }
 0x1d1   : > { %p19_p6 = scmp.ge.s32.totalorder %s3407_s22, 4  }
 0x1d3   :  { %21 = sbr.rel (!%p19_p6) target bundleno = 18 (0x12), region = 115 }
 0x1da   :  { %2007 = vsyncpa [#allocation5], 1 }
 0x1db   :  { %2009 = vsyncpa [#allocation5 + $0x1], 1 }
 0x1dc   :  { %2010 = vsyncpa [#allocation6], 1 }
 0x1dd   :  { %2012 = vsyncpa [#allocation6 + $0x1], 1 }

</bundles_post_ra>
